<compile_context>
chip_gen: v7x
topology: tpu7x:2x2x1
jax: 0.10.0
libtpu: 0.0.40
codegen_flags: <defaults>
</compile_context>

<pallas_src>
import functools
import itertools
import math

import numpy as np

import jax
import jax.numpy as jnp
from jax import lax
from jax.experimental import pallas as pl
from jax.experimental.pallas import tpu as pltpu

NUM_CLASSES = 21  # -> 'voc' cfg in the reference code
BASE_CFG = [64, 64, 'M', 128, 128, 'M', 256, 256, 256, 'C',
            512, 512, 512, 'M', 512, 512, 512]
EXTRAS_CFG = [256, 'S', 512, 128, 'S', 256, 128, 256, 128, 256]
MBOX = [4, 6, 6, 6, 4, 4]

VMEM_LIMIT = 48 * 1024 * 1024   # safe on v5e/v6e (128 MiB) and v7x (64 MiB)


def _round_up(x, m):
    return ((x + m - 1) // m) * m


# ----------------------------------------------------------------------------
# Pallas kernels
# ----------------------------------------------------------------------------
def _mm_bias_kernel(a_ref, w_ref, b_ref, o_ref, acc_ref, *, relu):
    """One (tm, tn) output tile; K is the innermost ('arbitrary') grid axis."""
    k = pl.program_id(2)

    @pl.when(k == 0)
    def _():
        acc_ref[...] = jnp.zeros_like(acc_ref)

    acc_ref[...] += jnp.dot(a_ref[...], w_ref[...],
                            preferred_element_type=jnp.float32)

    @pl.when(k == pl.num_programs(2) - 1)
    def _():
        r = acc_ref[...] + b_ref[...]          # f32 epilogue (v5e-safe)
        if relu:
            r = jnp.maximum(r, 0.0)
        o_ref[...] = r.astype(o_ref.dtype)


def _l2norm_kernel(x_ref, w_ref, o_ref):
    x = x_ref[...].astype(jnp.float32)
    ss = jnp.sum(x * x, axis=-1, keepdims=True)
    inv = pl.reciprocal(jnp.sqrt(ss) + 1e-10, approx=True)   # EUP path
    o_ref[...] = (x * inv * w_ref[...]).astype(o_ref.dtype)


# ----------------------------------------------------------------------------
# Tiling heuristics
# ----------------------------------------------------------------------------
def _pick_tk(K):
    """K tile: keep full K when small, otherwise a 128-multiple divisor."""
    if K <= 2304:
        return K
    for cand in (2304, 2048, 1536, 1152, 1024, 768, 512, 384, 256, 128):
        if K % cand == 0:
            return cand
    return K


def matmul_bias_pallas(a, w2, b2, relu, out_dtype):
    """out[M, N] = a[M, K](bf16) @ w2[K, N](bf16) + b2[1, N](f32), opt. ReLU."""
    M, K = a.shape
    N = w2.shape[1]

    tk = _pick_tk(K)
    tn = N if N <= 256 else 256              # N in {512, 1024} divides evenly
    tm_target = 1024 if K <= 1152 else 512   # bigger row tiles for HBM-bound small-K
    tm = min(tm_target, _round_up(M, 128))

    Mp = M
    if M < tm:                               # tiny layers only: keep block <= array
        Mp = tm
        a = jnp.pad(a, ((0, Mp - M), (0, 0)))

    grid = (pl.cdiv(Mp, tm), N // tn, K // tk)

    out = pl.pallas_call(
        functools.partial(_mm_bias_kernel, relu=relu),
        out_shape=jax.ShapeDtypeStruct((Mp, N), out_dtype),
        grid=grid,
        in_specs=[
            pl.BlockSpec((tm, tk), lambda i, j, k: (i, k)),
            pl.BlockSpec((tk, tn), lambda i, j, k: (k, j)),
            pl.BlockSpec((1, tn), lambda i, j, k: (0, j)),
        ],
        out_specs=pl.BlockSpec((tm, tn), lambda i, j, k: (i, j)),
        scratch_shapes=[pltpu.VMEM((tm, tn), jnp.float32)],
        compiler_params=pltpu.CompilerParams(
            dimension_semantics=("parallel", "parallel", "arbitrary"),
            vmem_limit_bytes=VMEM_LIMIT),
    )(a.astype(jnp.bfloat16), w2, b2)
    return out[:M] if Mp != M else out


def l2norm_pallas(x_nhwc, weight):
    """L2Norm(512, 20): per-pixel L2 normalisation over channels, scaled."""
    B, H, W, C = x_nhwc.shape
    M = B * H * W
    xf = x_nhwc.reshape(M, C)
    tm = 512
    Mp = M
    if M < tm:
        Mp = _round_up(M, 8)
        tm = Mp
        xf = jnp.pad(xf, ((0, Mp - M), (0, 0)))
    out = pl.pallas_call(
        _l2norm_kernel,
        out_shape=jax.ShapeDtypeStruct((Mp, C), x_nhwc.dtype),
        grid=(pl.cdiv(Mp, tm),),
        in_specs=[pl.BlockSpec((tm, C), lambda i: (i, 0)),
                  pl.BlockSpec((1, C), lambda i: (0, 0))],
        out_specs=pl.BlockSpec((tm, C), lambda i: (i, 0)),
        compiler_params=pltpu.CompilerParams(
            dimension_semantics=("parallel",),
            vmem_limit_bytes=VMEM_LIMIT),
    )(xf, weight.reshape(1, C))
    out = out[:M] if Mp != M else out
    return out.reshape(B, H, W, C)


# ----------------------------------------------------------------------------
# Plain-JAX glue: im2col, conv wrapper, max-pool, PriorBox
# ----------------------------------------------------------------------------
def im2col(x, kh, kw, stride, pad, dil):
    """x: NHWC -> patches (B*OH*OW, KH*KW*C) with feature order (kh, kw, c)."""
    B, H, W, C = x.shape
    xp = jnp.pad(x, ((0, 0), (pad, pad), (pad, pad), (0, 0)))
    Hp, Wp = H + 2 * pad, W + 2 * pad
    OH = (Hp - dil * (kh - 1) - 1) // stride + 1
    OW = (Wp - dil * (kw - 1) - 1) // stride + 1
    cols = []
    for i in range(kh):
        for j in range(kw):
            hs, ws = i * dil, j * dil
            patch = xp[:, hs:hs + (OH - 1) * stride + 1:stride,
                       ws:ws + (OW - 1) * stride + 1:stride, :]
            cols.append(patch)                       # (B, OH, OW, C)
    pat = jnp.stack(cols, axis=3)                    # (B, OH, OW, kh*kw, C)
    return pat.reshape(B * OH * OW, kh * kw * C), (B, OH, OW)


def conv2d_pallas(x, layer, out_dtype=jnp.bfloat16):
    kh, kw = layer['kh'], layer['kw']
    if kh == 1 and kw == 1 and layer['stride'] == 1 and layer['pad'] == 0:
        B, H, W, C = x.shape                         # 1x1 conv: no im2col needed
        patches, (B, OH, OW) = x.reshape(B * H * W, C), (B, H, W)
    else:
        patches, (B, OH, OW) = im2col(x, kh, kw, layer['stride'],
                                      layer['pad'], layer['dil'])
    out = matmul_bias_pallas(patches, layer['w2'], layer['b'],
                             layer['relu'], out_dtype)
    return out.reshape(B, OH, OW, -1)


def maxpool_nhwc(x, ks, stride, pad, ceil_mode):
    H, W = x.shape[1], x.shape[2]
    if ceil_mode:
        oh = -(-(H + 2 * pad - ks) // stride) + 1
        ow = -(-(W + 2 * pad - ks) // stride) + 1
        ph_hi = max(0, (oh - 1) * stride + ks - H - pad)
        pw_hi = max(0, (ow - 1) * stride + ks - W - pad)
        padding = ((0, 0), (pad, ph_hi), (pad, pw_hi), (0, 0))
    else:
        padding = ((0, 0), (pad, pad), (pad, pad), (0, 0))
    return lax.reduce_window(x, jnp.array(-jnp.inf, x.dtype), lax.max,
                             (1, ks, ks, 1), (1, stride, stride, 1), padding)


def apply_layer(x, layer):
    kind = layer['kind']
    if kind == 'conv':
        return conv2d_pallas(x, layer)               # trunk convs stay bf16
    if kind == 'pool':
        return maxpool_nhwc(x, layer['ks'], layer['stride'], layer['pad'], layer['ceil'])
    return x  # 'noop': ReLU slot already fused into the preceding conv's Pallas kernel


def build_priors():
    """PriorBox.forward() for the 'voc' cfg (SSD300): (8732, 4) in [0, 1]."""
    feature_maps = [38, 19, 10, 5, 3, 1]
    min_dim = 300
    steps = [8, 16, 32, 64, 100, 300]
    min_sizes = [30, 60, 111, 162, 213, 264]
    max_sizes = [60, 111, 162, 213, 264, 315]
    aspect_ratios = [[2], [2, 3], [2, 3], [2, 3], [2], [2]]
    mean = []
    for k, f in enumerate(feature_maps):
        for i, j in itertools.product(range(f), repeat=2):
            f_k = min_dim / steps[k]
            cx = (j + 0.5) / f_k
            cy = (i + 0.5) / f_k
            s_k = min_sizes[k] / min_dim
            mean += [cx, cy, s_k, s_k]
            s_kp = math.sqrt(s_k * (max_sizes[k] / min_dim))
            mean += [cx, cy, s_kp, s_kp]
            for ar in aspect_ratios[k]:
                mean += [cx, cy, s_k * math.sqrt(ar), s_k / math.sqrt(ar)]
                mean += [cx, cy, s_k / math.sqrt(ar), s_k * math.sqrt(ar)]
    pri = np.asarray(mean, np.float32).reshape(-1, 4)
    return jnp.asarray(np.clip(pri, 0.0, 1.0))


# ----------------------------------------------------------------------------
# Parameter construction (deterministic, mirrors vgg()/add_extras()/multibox())
# Weights are pre-transposed to (KH*KW*Cin, Cout) bf16 and bias pre-reshaped
# to (1, Cout) f32 once here (never per forward).
# ----------------------------------------------------------------------------
def make_conv(key, cin, cout, k, stride=1, pad=0, dil=1, relu=False):
    wkey, bkey = jax.random.split(key)
    fan_in = cin * k * k
    w = jax.random.normal(wkey, (cout, cin, k, k), jnp.float32) * math.sqrt(2.0 / fan_in)
    bound = 1.0 / math.sqrt(fan_in)
    b = jax.random.uniform(bkey, (cout,), jnp.float32, -bound, bound)
    w2 = jnp.transpose(w, (2, 3, 1, 0)).reshape(k * k * cin, cout).astype(jnp.bfloat16)
    return dict(kind='conv', w2=w2, b=b.reshape(1, cout), kh=k, kw=k,
                stride=stride, pad=pad, dil=dil, relu=relu)


def build_vgg(cfg, cin, key):
    layers, c = [], cin
    for v in cfg:
        if v == 'M':
            layers.append(dict(kind='pool', ks=2, stride=2, pad=0, ceil=False))
        elif v == 'C':
            layers.append(dict(kind='pool', ks=2, stride=2, pad=0, ceil=True))
        else:
            key, sub = jax.random.split(key)
            layers.append(make_conv(sub, c, v, 3, pad=1, relu=True))
            layers.append(dict(kind='noop'))          # the nn.ReLU slot
            c = v
    layers.append(dict(kind='pool', ks=3, stride=1, pad=1, ceil=False))      # pool5
    key, sub = jax.random.split(key)
    layers.append(make_conv(sub, 512, 1024, 3, pad=6, dil=6, relu=True))     # conv6 (dilated)
    layers.append(dict(kind='noop'))
    key, sub = jax.random.split(key)
    layers.append(make_conv(sub, 1024, 1024, 1, relu=True))                  # conv7
    layers.append(dict(kind='noop'))
    return layers, key


def build_extras(cfg, cin, key):
    layers, in_ch, flag = [], cin, False
    for k, v in enumerate(cfg):
        if in_ch != 'S':
            key, sub = jax.random.split(key)
            ks = (1, 3)[flag]
            if v == 'S':
                layers.append(make_conv(sub, in_ch, cfg[k + 1], ks, stride=2, pad=1, relu=True))
            else:
                layers.append(make_conv(sub, in_ch, v, ks, stride=1, pad=0, relu=True))
            flag = not flag
        in_ch = v
    return layers, key


def build_heads(key):
    """Per source, fuse the loc and conf 3x3 convs into one matmul along N."""
    src_channels = [512, 1024, 512, 256, 256, 256]   # vgg[21], vgg[-2], extras[1::2]
    heads = []
    for k, c in enumerate(src_channels):
        key, s1 = jax.random.split(key)
        key, s2 = jax.random.split(key)
        loc_l = make_conv(s1, c, MBOX[k] * 4, 3, pad=1, relu=False)
        conf_l = make_conv(s2, c, MBOX[k] * NUM_CLASSES, 3, pad=1, relu=False)
        heads.append(dict(kind='conv',
                          w2=jnp.concatenate([loc_l['w2'], conf_l['w2']], axis=1),
                          b=jnp.concatenate([loc_l['b'], conf_l['b']], axis=1),
                          kh=3, kw=3, stride=1, pad=1, dil=1, relu=False,
                          n_loc=MBOX[k] * 4))
    return heads, key


def build_ssd_params(key):
    vgg, key = build_vgg(BASE_CFG, 3, key)
    extras, key = build_extras(EXTRAS_CFG, 1024, key)
    heads, key = build_heads(key)
    return dict(vgg=vgg, extras=extras, heads=heads,
                l2norm_w=jnp.full((512,), 20.0, jnp.float32),
                priors=build_priors())


# ----------------------------------------------------------------------------
# SSD forward (phase == 'train')
# ----------------------------------------------------------------------------
def ssd_forward(x_nchw, params):
    x = jnp.transpose(x_nchw, (0, 2, 3, 1)).astype(jnp.bfloat16)  # NCHW -> NHWC, bf16
    sources = []

    vgg = params['vgg']
    for k in range(23):                      # up to conv4_3 relu
        x = apply_layer(x, vgg[k])
    sources.append(l2norm_pallas(x, params['l2norm_w']))
    for k in range(23, len(vgg)):            # through conv7 relu
        x = apply_layer(x, vgg[k])
    sources.append(x)

    for k, lyr in enumerate(params['extras']):
        x = apply_layer(x, lyr)              # F.relu fused into the Pallas matmul
        if k % 2 == 1:
            sources.append(x)

    locs, confs = [], []
    for src, head in zip(sources, params['heads']):
        out = conv2d_pallas(src, head, out_dtype=jnp.float32)   # fused loc+conf
        B = out.shape[0]
        nloc = head['n_loc']
        locs.append(out[..., :nloc].reshape(B, -1))   # NHWC == permute(0,2,3,1) already
        confs.append(out[..., nloc:].reshape(B, -1))
    loc = jnp.concatenate(locs, axis=1)
    conf = jnp.concatenate(confs, axis=1)
    B = loc.shape[0]
    return (loc.reshape(B, -1, 4),
            conf.reshape(B, -1, NUM_CLASSES),
            params['priors'])


if __name__ == "__main__":
    key = jax.random.PRNGKey(0)
    key, xkey = jax.random.split(key)
    params = build_ssd_params(key)

    # SSD300 geometry (the extras' valid 3x3 convs) requires the 300x300 input;
    # batch kept at 1 to stay small.
    x = jax.random.normal(xkey, (1, 3, 300, 300), jnp.float32)

    loc, conf, priors = ssd_forward(x, params)
    jax.block_until_ready((loc, conf, priors))

    assert loc.shape == (1, 8732, 4), loc.shape
    assert conf.shape == (1, 8732, NUM_CLASSES), conf.shape
    assert priors.shape == (8732, 4), priors.shape
    assert loc.shape[1] == priors.shape[0]
    assert bool(jnp.all(jnp.isfinite(loc))) and bool(jnp.all(jnp.isfinite(conf)))
    print("KERNEL_OK")
</pallas_src>

<mosaic_0001>
module attributes {stable_mosaic.version = 11 : i64} {
  func.func @_mm_bias_kernel(%arg0: i32, %arg1: i32, %arg2: i32, %arg3: memref<1024x27xbf16, #tpu.memory_space<vmem>>, %arg4: memref<27x64xbf16, #tpu.memory_space<vmem>>, %arg5: memref<1x64xf32, #tpu.memory_space<vmem>>, %arg6: memref<1024x64xbf16, #tpu.memory_space<vmem>>, %arg7: memref<1024x64xf32, #tpu.memory_space<vmem>>) attributes {dimension_semantics = [#tpu.dimension_semantics<parallel>, #tpu.dimension_semantics<parallel>, #tpu.dimension_semantics<arbitrary>], iteration_bounds = array<i64: 88, 1, 1>, scalar_prefetch = 0 : i64, scratch_operands = 1 : i64, tpu.core_type = #tpu.core_type<tc>, window_params = [{transform_indices = @transform_0, window_bounds = array<i64: 1024, 27>}, {transform_indices = @transform_1, window_bounds = array<i64: 27, 64>}, {transform_indices = @transform_2, window_bounds = array<i64: 1, 64>}, {transform_indices = @transform_3, window_bounds = array<i64: 1024, 64>}]} {
    %c0_i32 = arith.constant 0 : i32
    %0 = arith.cmpi eq, %arg2, %c0_i32 : i32
    %1 = arith.extui %0 : i1 to i32
    %c0_i32_0 = arith.constant 0 : i32
    %2 = arith.cmpi ne, %1, %c0_i32_0 : i32
    scf.if %2 {
      %cst_10 = arith.constant 0.000000e+00 : f32
      %12 = vector.broadcast %cst_10 : f32 to vector<1024x64xf32>
      %c0_11 = arith.constant 0 : index
      %c0_12 = arith.constant 0 : index
      %13 = vector.load %arg7[%c0_11, %c0_12] : memref<1024x64xf32, #tpu.memory_space<vmem>>, vector<1024x64xf32>
      tpu.vector_store %arg7[%c0_11, %c0_12], %12 {strides = array<i32>} : memref<1024x64xf32, #tpu.memory_space<vmem>>, vector<1024x64xf32>,
    } else {
    }
    %c0 = arith.constant 0 : index
    %c0_1 = arith.constant 0 : index
    %3 = vector.load %arg7[%c0, %c0_1] : memref<1024x64xf32, #tpu.memory_space<vmem>>, vector<1024x64xf32>
    %c0_2 = arith.constant 0 : index
    %c0_3 = arith.constant 0 : index
    %4 = vector.load %arg3[%c0_2, %c0_3] : memref<1024x27xbf16, #tpu.memory_space<vmem>>, vector<1024x27xbf16>
    %c0_4 = arith.constant 0 : index
    %c0_5 = arith.constant 0 : index
    %5 = vector.load %arg4[%c0_4, %c0_5] : memref<27x64xbf16, #tpu.memory_space<vmem>>, vector<27x64xbf16>
    %cst = arith.constant dense<0.000000e+00> : vector<1024x64xf32>
    %6 = tpu.matmul %4, %5, %cst {dimension_numbers = #tpu.dot_dimension_numbers<[1], [0], [0], [1], [0, 0, 1, 1], [], []>} : vector<1024x27xbf16>, vector<27x64xbf16>, vector<1024x64xf32> -> vector<1024x64xf32>
    %7 = arith.addf %3, %6 : vector<1024x64xf32>
    %c0_6 = arith.constant 0 : index
    %c0_7 = arith.constant 0 : index
    %8 = vector.load %arg7[%c0_6, %c0_7] : memref<1024x64xf32, #tpu.memory_space<vmem>>, vector<1024x64xf32>
    tpu.vector_store %arg7[%c0_6, %c0_7], %7 {strides = array<i32>} : memref<1024x64xf32, #tpu.memory_space<vmem>>, vector<1024x64xf32>,
    %c0_i32_8 = arith.constant 0 : i32
    %9 = arith.cmpi eq, %arg2, %c0_i32_8 : i32
    %10 = arith.extui %9 : i1 to i32
    %c0_i32_9 = arith.constant 0 : i32
    %11 = arith.cmpi ne, %10, %c0_i32_9 : i32
    scf.if %11 {
      %c0_10 = arith.constant 0 : index
      %c0_11 = arith.constant 0 : index
      %12 = vector.load %arg7[%c0_10, %c0_11] : memref<1024x64xf32, #tpu.memory_space<vmem>>, vector<1024x64xf32>
      %c0_12 = arith.constant 0 : index
      %c0_13 = arith.constant 0 : index
      %13 = vector.load %arg5[%c0_12, %c0_13] : memref<1x64xf32, #tpu.memory_space<vmem>>, vector<1x64xf32>
      %14 = vector.broadcast %13 : vector<1x64xf32> to vector<1024x64xf32>
      %15 = arith.addf %12, %14 : vector<1024x64xf32>
      %cst_14 = arith.constant 0.000000e+00 : f32
      %16 = vector.broadcast %cst_14 : f32 to vector<1024x64xf32>
      %17 = arith.maximumf %15, %16 : vector<1024x64xf32>
      %18 = arith.truncf %17 : vector<1024x64xf32> to vector<1024x64xbf16>
      %c0_15 = arith.constant 0 : index
      %c0_16 = arith.constant 0 : index
      %19 = vector.load %arg6[%c0_15, %c0_16] : memref<1024x64xbf16, #tpu.memory_space<vmem>>, vector<1024x64xbf16>
      tpu.vector_store %arg6[%c0_15, %c0_16], %18 {strides = array<i32>} : memref<1024x64xbf16, #tpu.memory_space<vmem>>, vector<1024x64xbf16>,
    } else {
    }
    return
  }
  func.func @transform_0(%arg0: i32, %arg1: i32, %arg2: i32) -> (i32, i32) {
    %c0_i32 = arith.constant 0 : i32
    return %arg0, %arg2 : i32, i32
  }
  func.func @transform_1(%arg0: i32, %arg1: i32, %arg2: i32) -> (i32, i32) {
    %c0_i32 = arith.constant 0 : i32
    return %arg2, %arg1 : i32, i32
  }
  func.func @transform_2(%arg0: i32, %arg1: i32, %arg2: i32) -> (i32, i32) {
    %c0_i32 = arith.constant 0 : i32
    %c0_i32_0 = arith.constant 0 : i32
    return %c0_i32, %arg1 : i32, i32
  }
  func.func @transform_3(%arg0: i32, %arg1: i32, %arg2: i32) -> (i32, i32) {
    %c0_i32 = arith.constant 0 : i32
    return %arg0, %arg1 : i32, i32
  }
}

</mosaic_0001>

<bundles_post_ra>
// kernel: tpu_custom_call.1
= control target key start
LH: loop header
LB: loop body
LE: loop exit
PB: predicated region body
PF: predicated region fallthrough
CT: control target
= control target key end

     0   :  { %8 = vsyncpa [#allocation4], 0  ;;  %s5165_s0 = inlined_call_operand.hbm [shape: bf16[90000,27], index: 0, kind: input, shape index: {}]   ;;  %s5166_s1 = inlined_call_operand.vmem [shape: bf16[27,64], index: 1, kind: input, shape index: {}]   ;;  %s5167_s2 = inlined_call_operand.vmem [shape: f32[1,64], index: 2, kind: input, shape index: {}]   ;;  %s5168_s3 = inlined_call_operand.hbm [shape: bf16[90000,64], index: 3, kind: output, shape index: {}]  }
   0x1   :  { %10 = vsyncpa [#allocation4 + $0x1], 0 }
   0x2   :  { %11 = vsyncpa [#allocation5], 0 }
   0x3   :  { %13 = vsyncpa [#allocation5 + $0x1], 0  ;;  %s4062_s12 = smov 0   ;;  %s4064_s13 = smov 0  }
   0x4   :  { %s4066_s14 = smov 0   ;;  %s4068_s15 = smov 0  }
   0x5   :  { %s4070_s16 = smov 0   ;;  %s4072_s17 = smov 0  }
   0x6 LB: > { %s3177_s18 = sadd.s32 4294967295, %s4032_s17   ;;  %s3178_s19 = sadd.s32 4294967294, %s4032_s17   ;;  %s4032_s17 = sphi %s4072_s17, %s19_s17   ;;  %s4028_s16 = sphi %s4070_s16, %s5177_s16   ;;  %s4024_s15 = sphi %s4068_s15, %s5176_s15   ;;  %s4020_s14 = sphi %s4066_s14, %s5175_s14   ;;  %s4016_s13 = sphi %s4064_s13, %s5174_s13   ;;  %s4012_s12 = sphi %s4062_s12, %s5173_s12  }
   0x7   : > { %s38_s20 = sadd.s32 1, %s4028_s16  ;;  %s47_s21 = sadd.s32 1, %s4020_s14 }
   0x8   : > { %p40_p0 = scmp.ge.s32.totalorder %s38_s20, 88  ;;  %p54_p1 = scmp.ne.s32.totalorder %s4020_s14, %s4016_s13 }
   0x9   : > { %p55_p2 = scmp.eq.s32.totalorder %s4032_s17, 0  ;;  %p60_p3 = scmp.ne.s32.totalorder %s4016_s13, %s4012_s12 }
   0xa   : > { %s5179_s20 = smov (%p40_p0, %s38_s20), 0  ;;  %p61_p5 = scmp.eq.s32.totalorder %s3177_s18, 0 }
   0xb   : > { %p56_p4 = por %p55_p2, %p54_p1  ;;  %s42_s22 = ssub.s32 %s4028_s16, %s5179_s20 }
   0xc   : > { %p140_p6 = scmp.eq.s32.totalorder %s3177_s18, 87  ;;  %p45_p7 = scmp.eq.s32.totalorder %s42_s22, 0 }
   0xd   : > { %p4105_p8 = por %p61_p5, %p60_p3  ;;  %p146_p10 = scmp.eq.s32.totalorder %s3178_s19, 87 }
   0xe   : > { %p4109_p9 = por %p140_p6, %p54_p1  ;;  %p3182_p12 = scmp.ge.s32.totalorder %s4032_s17, 88 }
   0xf   : > { %s4114_s25 = scalar_select %p45_p7, %s4020_s14, %s47_s21  }
  0x10   : > { %p4116_p11 = por %p146_p10, %p60_p3  ;;  %180 = sbr.rel (%p3182_p12) target bundleno = 58 (0x3a), region = 24 }
  0x12   : > { %s5171_s26 = scalar_select %p4116_p11, 1, 0 }
  0x17   : > { %183 = sbr.rel (!%p56_p4) target bundleno = 58 (0x3a), region = 28  ;;  %s184_s27 = sand.u32 (%p56_p4), 1, %s4020_s14  }
  0x18   : > { %s3184_s28 = sshll.u32 (%p56_p4), %s4028_s16, 7  ;;  %s3183_s29 = sshll.u32 (%p56_p4), %s184_s27, 9 }
  0x19   : > { %s190_s30 = ssub.s32 (%p56_p4), 11250, %s3184_s28  ;;  %s4126_s6 = scalar_lea.sflag (%p56_p4), [#allocation4], %s184_s27 }
  0x1a   : > { %p191_p13 = scmp.lt.s32.totalorder (%p56_p4), %s190_s30, 128  ;;  %s188_s7 = scalar_lea.vmem (%p56_p4), [#allocation3], %s3183_s29 }
  0x1e   : > { %s5181_s30 = smov (!%p191_p13, %s190_s30), 128 }
  0x1f   : > { %s4123_s4 = sshll.u32 %s5181_s30, 6 }
  0x20   : > { %s195_s5 = ssub.s32 8192, %s4123_s4 }
  0x21   : > { %196 = vsyncadd %s4126_s6, %s195_s5  ;;  %p3186_p0 = scmp.ne.s32.totalorder %s4123_s4, 0  ;;  %s3461_s8 = sshll.u32 %s4028_s16, 13 }
  0x22   : > { %s4134_s11 = scalar_lea.hbm %s5165_s0, %s3461_s8  ;;  %s202_s18 = sshll.u32 %s188_s7, 4  ;;  %s4136_s18 = int_to_ptr.vmem [resolvable:$true] %s202_s18 }
  0x23   : > { %s3922_s19 = scalar_lea.hbm %s4134_s11, %s4123_s4  ;;  %s3926_s27 = scalar_lea.hbm %s5165_s0, 720000 }
  0x24   : > { %p3923_p1 = scmp.ne.s32.totalorder %s4134_s11, %s3922_s19  ;;  %p3927_p4 = scmp.lt.u32.totalorder %s4134_s11, %s5165_s0 }
  0x25   : > { %p3928_p5 = scmp.lt.u32.totalorder %s3926_s27, %s3922_s19  ;;  %p3930_p7 = scmp.lt.u32.totalorder %s3922_s19, %s4134_s11 }
  0x26   : > { %p3924_p2 = pnand %p3923_p1, %p3186_p0 }
  0x27   : > { %p3929_p6 = por %p3928_p5, %p3927_p4 }
  0x28   : > { %p3925_p3 = pneg %p3924_p2 }
  0x29   : > { %p3931_p10 = por %p3930_p7, %p3929_p6 }
  0x2b   : > { %p3932_p12 = pnand %p3931_p10, %p3925_p3 }
  0x2d   : > { %3935 = shalt.err (!%p3932_p12)
}
  0x2e   : > { %s3936_s30 = scalar_lea.vmem %s4136_s18, %s4123_s4  ;;  %s4034_s5 = smov [#allocation3]  }
  0x2f   : > { %p3937_p13 = scmp.ne.s32.totalorder %s4136_s18, %s3936_s30  ;;  %s3940_s7 = sshll.u32 %s4034_s5, 4  ;;  %s3941_s7 = int_to_ptr.vmem [resolvable:$false] %s3940_s7 }
  0x30   : > { %s3942_s8 = scalar_lea.vmem %s3941_s7, 16384  ;;  %p3943_p11 = scmp.lt.s32.totalorder %s4136_s18, %s3941_s7 }
  0x31   : > { %p3938_p1 = pnand %p3937_p13, %p3186_p0  ;;  %p3944_p4 = scmp.lt.s32.totalorder %s3942_s8, %s3936_s30 }
  0x33   : > { %p3939_p2 = pneg %p3938_p1  ;;  %p3945_p5 = por %p3944_p4, %p3943_p11 }
  0x35   : > { %p3946_p6 = pnand %p3945_p5, %p3939_p2 }
  0x37   : > { %3949 = shalt.err (!%p3946_p6)
}
  0x38   : > { %s4035_s9 = smov 64   ;;  %s4036_s10 = smov 4  }
  0x39   : > { %208 = dma.hbm_to_vmem [thread:$0]  (%p3186_p0), %s4134_s11, %s4123_s4, %s4136_s18, %s4126_s6, %s4035_s9, %s4035_s9, %s4036_s10  }
  0x3a PF: > { %p3190_p3 = scmp.ge.s32.totalorder %s4032_s17, 1  ;;  %p210_p7 = scmp.lt.s32.totalorder %s4032_s17, 89 }
  0x3c   : > { %p211_p10 = pnand %p3190_p3, %p210_p7 }
  0x3d   : > { %s4166_s19 = sand.u32 (!%p211_p10), 1, %s4016_s13  }
  0x3e   : > { %214 = sbr.rel (%p211_p10) target bundleno = 482 (0x1e2), region = 32  ;;  %s3191_s21 = sshll.u32 (!%p211_p10), %s4166_s19, 9 }
  0x3f   : > { %s217_s22 = scalar_lea.sflag (!%p211_p10), [#allocation4], %s4166_s19  ;;  %s4172_s27 = scalar_lea.vmem (!%p211_p10), [#allocation3], %s3191_s21 }
  0x45   : > { %4003 = dma.done.wait (%p4105_p8), %s217_s22, 8192  }
  0x46   : > { %4005 = vsyncadd (%p4105_p8), %s217_s22, 4294959104  ;;  %vm1194_vm0 = vcmask 1044480   ;;  %vm1195_vm1 = vcmask 1045504   ;;  %v4037_v0 = vmov 65535   ;;  %vm1001_vm2 = vcmask 220160   ;;  %v3854_v2 = vld [vmem:[%s5166_s1] sm:$0xff]  }
  0x47   : > { %v1196_v1 = vsel %vm1194_vm0, 4294967295, %v4037_v0  ;;  %v3855_v4 = vld [vmem:[%s5166_s1 + $0x8] sm:$0x3f]   ;;  %3657 = vmatprep.subr.bf16.mxu0 %v3854_v2  ;;  %3789 = vmatprep.subr.bf16.mxu1 %v3854_v2  ;;  %v3856_v5 = vld [vmem:[%s4172_s27] sm:$0xff]   ;;  %vm281_vm3 = vcmask 523264   ;;  %v4038_v10 = vmov 0.0  }
  0x48   : > { %v1197_v3 = vsel %vm1195_vm1, %v1196_v1, 0  ;;  %3658 = vmatpush3.bf16.msra.mxu0 %v3854_v2  ;;  %3791 = vmatpush3.bf16.msra.mxu1 %v3854_v2  ;;  %v4188_v7 = vld [vmem:[%s4172_s27 + $0x100] sm:$0xff]   ;;  %v4192_v8 = vld [vmem:[%s4172_s27 + $0x8] sm:$0xff]   ;;  %284 = vst.msk [vmem:[#allocation2 + $0x10] sm:$0xff] %vm281_vm3, %v4038_v10  ;;  %282 = vst.msk [vmem:[#allocation2] sm:$0xff] %vm281_vm3, %v4038_v10  ;;  %vm2909_vm4 = vcmask 519168  }
  0x49   : > { %v4185_v6 = vand.u32 %v3855_v4, %v1197_v3  ;;  %3661 = vmatprep.mubr.msk.bf16.mxu0 %vm1001_vm2, %v3856_v5  ;;  %v4197_v9 = vld [vmem:[%s4172_s27 + $0x108] sm:$0xff]   ;;  %283 = vst.msk [vmem:[#allocation2 + $0x8] sm:$0xff] %vm281_vm3, %v4038_v10  ;;  %285 = vst.msk [vmem:[#allocation2 + $0x18] sm:$0xff] %vm281_vm3, %v4038_v10  ;;  %3725 = vmatprep.mubr.msk.bf16.mxu1 %vm1001_vm2, %v4188_v7  ;;  %v3860_v11 = vld [vmem:[%s4172_s27 + $0x10] sm:$0xff]   ;;  %s4614_s29 = scalar_lea.vmem [#allocation6], %s3191_s21  ;;  %s3039_s9 = scalar_lea.sflag [#allocation5], %s4166_s19 }
  0x4a   : > { %286 = vst.msk [vmem:[#allocation2 + $0x20] sm:$0xff] %vm281_vm3, %v4038_v10  ;;  %287 = vst.msk [vmem:[#allocation2 + $0x28] sm:$0xff] %vm281_vm3, %v4038_v10  ;;  %v3861_v12 = vld [vmem:[%s4172_s27 + $0x110] sm:$0xff]   ;;  %v3862_v13 = vld [vmem:[%s4172_s27 + $0x18] sm:$0xff]   ;;  %s3453_s10 = sshll.u32 (%p4109_p9), %s4024_s15, 7 }
  0x4b   : > { %3659 = vmatprep.subr.bf16.mxu0 %v4185_v6  ;;  %3790 = vmatprep.subr.bf16.mxu1 %v4185_v6  ;;  %288 = vst.msk [vmem:[#allocation2 + $0x30] sm:$0xff] %vm281_vm3, %v4038_v10  ;;  %289 = vst.msk [vmem:[#allocation2 + $0x38] sm:$0xff] %vm281_vm3, %v4038_v10  ;;  %v3863_v14 = vld [vmem:[%s4172_s27 + $0x118] sm:$0xff]   ;;  %v3864_v15 = vld [vmem:[%s4172_s27 + $0x20] sm:$0xff]   ;;  %s3047_s21 = ssub.s32 (%p4109_p9), 11250, %s3453_s10 }
  0x4c   : > { %290 = vst.msk [vmem:[#allocation2 + $0x40] sm:$0xff] %vm281_vm3, %v4038_v10  ;;  %291 = vst.msk [vmem:[#allocation2 + $0x48] sm:$0xff] %vm281_vm3, %v4038_v10  ;;  %3660 = vmatpush3.bf16.msra.mxu0 %v4185_v6  ;;  %3792 = vmatpush3.bf16.msra.mxu1 %v4185_v6  ;;  %v3865_v16 = vld [vmem:[%s4172_s27 + $0x120] sm:$0xff]   ;;  %v3866_v17 = vld [vmem:[%s4172_s27 + $0x28] sm:$0xff]   ;;  %p3048_p8 = scmp.lt.s32.totalorder (%p4109_p9), %s3047_s21, 128 }
  0x4d   : > { %292 = vst.msk [vmem:[#allocation2 + $0x50] sm:$0xff] %vm281_vm3, %v4038_v10  ;;  %293 = vst.msk [vmem:[#allocation2 + $0x58] sm:$0xff] %vm281_vm3, %v4038_v10  ;;  %v3867_v18 = vld [vmem:[%s4172_s27 + $0x128] sm:$0xff]   ;;  %v3868_v19 = vld [vmem:[%s4172_s27 + $0x30] sm:$0xff]  }
  0x4e   : > { %294 = vst.msk [vmem:[#allocation2 + $0x60] sm:$0xff] %vm281_vm3, %v4038_v10  ;;  %295 = vst.msk [vmem:[#allocation2 + $0x68] sm:$0xff] %vm281_vm3, %v4038_v10  ;;  %v3869_v20 = vld [vmem:[%s4172_s27 + $0x130] sm:$0xff]   ;;  %v3870_v21 = vld [vmem:[%s4172_s27 + $0x38] sm:$0xff]  }
  0x4f   : > { %296 = vst.msk [vmem:[#allocation2 + $0x70] sm:$0xff] %vm281_vm3, %v4038_v10  ;;  %297 = vst.msk [vmem:[#allocation2 + $0x78] sm:$0xff] %vm281_vm3, %v4038_v10  ;;  %3662 = vmatmul.mubr.msk.bf16.vlgmr.msra.gmra.mrb[0].mxu0 %vm1001_vm2, %v4192_v8  ;;  %3726 = vmatmul.mubr.msk.bf16.vlgmr.msra.gmra.mrb[0].mxu1 %vm1001_vm2, %v4197_v9  ;;  %v3871_v22 = vld [vmem:[%s4172_s27 + $0x138] sm:$0xff]   ;;  %v3872_v23 = vld [vmem:[%s4172_s27 + $0x40] sm:$0xff]  }
  0x50   : > { %298 = vst.msk [vmem:[#allocation2 + $0x80] sm:$0xff] %vm281_vm3, %v4038_v10  ;;  %299 = vst.msk [vmem:[#allocation2 + $0x88] sm:$0xff] %vm281_vm3, %v4038_v10  ;;  %3665 = vmatprep.mubr.msk.bf16.mxu0 %vm1001_vm2, %v3860_v11  ;;  %3729 = vmatprep.mubr.msk.bf16.mxu1 %vm1001_vm2, %v3861_v12  ;;  %v3873_v24 = vld [vmem:[%s4172_s27 + $0x140] sm:$0xff]   ;;  %v3874_v25 = vld [vmem:[%s4172_s27 + $0x48] sm:$0xff]  }
  0x51   : > { %300 = vst.msk [vmem:[#allocation2 + $0x90] sm:$0xff] %vm281_vm3, %v4038_v10  ;;  %301 = vst.msk [vmem:[#allocation2 + $0x98] sm:$0xff] %vm281_vm3, %v4038_v10  ;;  %v3875_v26 = vld [vmem:[%s4172_s27 + $0x148] sm:$0xff]   ;;  %v3876_v27 = vld [vmem:[%s4172_s27 + $0x50] sm:$0xff]  }
  0x52   : > { %302 = vst.msk [vmem:[#allocation2 + $0xa0] sm:$0xff] %vm281_vm3, %v4038_v10  ;;  %303 = vst.msk [vmem:[#allocation2 + $0xa8] sm:$0xff] %vm281_vm3, %v4038_v10  ;;  %v3877_v28 = vld [vmem:[%s4172_s27 + $0x150] sm:$0xff]   ;;  %v3878_v29 = vld [vmem:[%s4172_s27 + $0x58] sm:$0xff]  }
  0x53   : > { %304 = vst.msk [vmem:[#allocation2 + $0xb0] sm:$0xff] %vm281_vm3, %v4038_v10  ;;  %305 = vst.msk [vmem:[#allocation2 + $0xb8] sm:$0xff] %vm281_vm3, %v4038_v10  ;;  %v3879_v30 = vld [vmem:[%s4172_s27 + $0x158] sm:$0xff]   ;;  %v3880_v31 = vld [vmem:[%s4172_s27 + $0x60] sm:$0xff]  }
  0x54   : > { %306 = vst.msk [vmem:[#allocation2 + $0xc0] sm:$0xff] %vm281_vm3, %v4038_v10  ;;  %307 = vst.msk [vmem:[#allocation2 + $0xc8] sm:$0xff] %vm281_vm3, %v4038_v10  ;;  %v3881_v32 = vld [vmem:[%s4172_s27 + $0x160] sm:$0xff]   ;;  %v3882_v33 = vld [vmem:[%s4172_s27 + $0x68] sm:$0xff]  }
  0x55   : > { %308 = vst.msk [vmem:[#allocation2 + $0xd0] sm:$0xff] %vm281_vm3, %v4038_v10  ;;  %309 = vst.msk [vmem:[#allocation2 + $0xd8] sm:$0xff] %vm281_vm3, %v4038_v10  ;;  %v3883_v34 = vld [vmem:[%s4172_s27 + $0x168] sm:$0xff]   ;;  %v3884_v35 = vld [vmem:[%s4172_s27 + $0x70] sm:$0xff]  }
  0x56   : > { %310 = vst.msk [vmem:[#allocation2 + $0xe0] sm:$0xff] %vm281_vm3, %v4038_v10  ;;  %311 = vst.msk [vmem:[#allocation2 + $0xe8] sm:$0xff] %vm281_vm3, %v4038_v10  ;;  %v3885_v36 = vld [vmem:[%s4172_s27 + $0x170] sm:$0xff]   ;;  %v3886_v37 = vld [vmem:[%s4172_s27 + $0x78] sm:$0xff]  }
  0x57   : > { %312 = vst.msk [vmem:[#allocation2 + $0xf0] sm:$0xff] %vm281_vm3, %v4038_v10  ;;  %313 = vst.msk [vmem:[#allocation2 + $0xf8] sm:$0xff] %vm281_vm3, %v4038_v10  ;;  %3666 = vmatmul.mubr.msk.bf16.gmra.mrb[4].mxu0 %vm1001_vm2, %v3862_v13  ;;  %3730 = vmatmul.mubr.msk.bf16.gmra.mrb[4].mxu1 %vm1001_vm2, %v3863_v14  ;;  %v3887_v38 = vld [vmem:[%s4172_s27 + $0x178] sm:$0xff]   ;;  %v3888_v39 = vld [vmem:[%s4172_s27 + $0x80] sm:$0xff]  }
  0x58   : > { %314 = vst.msk [vmem:[#allocation2 + $0x100] sm:$0xff] %vm281_vm3, %v4038_v10  ;;  %315 = vst.msk [vmem:[#allocation2 + $0x108] sm:$0xff] %vm281_vm3, %v4038_v10  ;;  %3669 = vmatprep.mubr.msk.bf16.mxu0 %vm1001_vm2, %v3864_v15  ;;  %3733 = vmatprep.mubr.msk.bf16.mxu1 %vm1001_vm2, %v3865_v16  ;;  %v3889_v40 = vld [vmem:[%s4172_s27 + $0x180] sm:$0xff]   ;;  %v3890_v41 = vld [vmem:[%s4172_s27 + $0x88] sm:$0xff]  }
  0x59   : > { %316 = vst.msk [vmem:[#allocation2 + $0x110] sm:$0xff] %vm281_vm3, %v4038_v10  ;;  %317 = vst.msk [vmem:[#allocation2 + $0x118] sm:$0xff] %vm281_vm3, %v4038_v10  ;;  %v3891_v42 = vld [vmem:[%s4172_s27 + $0x188] sm:$0xff]   ;;  %v3892_v43 = vld [vmem:[%s4172_s27 + $0x90] sm:$0xff]  }
  0x5a   : > { %318 = vst.msk [vmem:[#allocation2 + $0x120] sm:$0xff] %vm281_vm3, %v4038_v10  ;;  %319 = vst.msk [vmem:[#allocation2 + $0x128] sm:$0xff] %vm281_vm3, %v4038_v10  ;;  %v3893_v44 = vld [vmem:[%s4172_s27 + $0x190] sm:$0xff]   ;;  %v3894_v45 = vld [vmem:[%s4172_s27 + $0x98] sm:$0xff]  }
  0x5b   : > { %320 = vst.msk [vmem:[#allocation2 + $0x130] sm:$0xff] %vm281_vm3, %v4038_v10  ;;  %321 = vst.msk [vmem:[#allocation2 + $0x138] sm:$0xff] %vm281_vm3, %v4038_v10  ;;  %v3895_v46 = vld [vmem:[%s4172_s27 + $0x198] sm:$0xff]   ;;  %v3896_v47 = vld [vmem:[%s4172_s27 + $0xa0] sm:$0xff]  }
  0x5c   : > { %322 = vst.msk [vmem:[#allocation2 + $0x140] sm:$0xff] %vm281_vm3, %v4038_v10  ;;  %323 = vst.msk [vmem:[#allocation2 + $0x148] sm:$0xff] %vm281_vm3, %v4038_v10  ;;  %v3897_v48 = vld [vmem:[%s4172_s27 + $0x1a0] sm:$0xff]   ;;  %v3898_v49 = vld [vmem:[%s4172_s27 + $0xa8] sm:$0xff]  }
  0x5d   : > { %324 = vst.msk [vmem:[#allocation2 + $0x150] sm:$0xff] %vm281_vm3, %v4038_v10  ;;  %325 = vst.msk [vmem:[#allocation2 + $0x158] sm:$0xff] %vm281_vm3, %v4038_v10  ;;  %v3899_v50 = vld [vmem:[%s4172_s27 + $0x1a8] sm:$0xff]   ;;  %v3900_v51 = vld [vmem:[%s4172_s27 + $0xb0] sm:$0xff]  }
  0x5e   : > { %326 = vst.msk [vmem:[#allocation2 + $0x160] sm:$0xff] %vm281_vm3, %v4038_v10  ;;  %327 = vst.msk [vmem:[#allocation2 + $0x168] sm:$0xff] %vm281_vm3, %v4038_v10  ;;  %v3901_v52 = vld [vmem:[%s4172_s27 + $0x1b0] sm:$0xff]   ;;  %v3902_v53 = vld [vmem:[%s4172_s27 + $0xb8] sm:$0xff]  }
  0x5f   : > { %328 = vst.msk [vmem:[#allocation2 + $0x170] sm:$0xff] %vm281_vm3, %v4038_v10  ;;  %329 = vst.msk [vmem:[#allocation2 + $0x178] sm:$0xff] %vm281_vm3, %v4038_v10  ;;  %3670 = vmatmul.mubr.msk.bf16.gmra.mrb[8].mxu0 %vm1001_vm2, %v3866_v17  ;;  %3734 = vmatmul.mubr.msk.bf16.gmra.mrb[8].mxu1 %vm1001_vm2, %v3867_v18  ;;  %v3903_v54 = vld [vmem:[%s4172_s27 + $0x1b8] sm:$0xff]   ;;  %v3904_v55 = vld [vmem:[%s4172_s27 + $0xc0] sm:$0xff]  }
  0x60   : > { %330 = vst.msk [vmem:[#allocation2 + $0x180] sm:$0xff] %vm281_vm3, %v4038_v10  ;;  %331 = vst.msk [vmem:[#allocation2 + $0x188] sm:$0xff] %vm281_vm3, %v4038_v10  ;;  %3673 = vmatprep.mubr.msk.bf16.mxu0 %vm1001_vm2, %v3868_v19  ;;  %3737 = vmatprep.mubr.msk.bf16.mxu1 %vm1001_vm2, %v3869_v20  ;;  %v3905_v56 = vld [vmem:[%s4172_s27 + $0x1c0] sm:$0xff]   ;;  %v3906_v57 = vld [vmem:[%s4172_s27 + $0xc8] sm:$0xff]  }
  0x61   : > { %332 = vst.msk [vmem:[#allocation2 + $0x190] sm:$0xff] %vm281_vm3, %v4038_v10  ;;  %333 = vst.msk [vmem:[#allocation2 + $0x198] sm:$0xff] %vm281_vm3, %v4038_v10  ;;  %v3907_v58 = vld [vmem:[%s4172_s27 + $0x1c8] sm:$0xff]   ;;  %v3908_v59 = vld [vmem:[%s4172_s27 + $0xd0] sm:$0xff]  }
  0x62   : > { %334 = vst.msk [vmem:[#allocation2 + $0x1a0] sm:$0xff] %vm281_vm3, %v4038_v10  ;;  %335 = vst.msk [vmem:[#allocation2 + $0x1a8] sm:$0xff] %vm281_vm3, %v4038_v10  ;;  %v3909_v60 = vld [vmem:[%s4172_s27 + $0x1d0] sm:$0xff]   ;;  %v3910_v61 = vld [vmem:[%s4172_s27 + $0xd8] sm:$0xff]  }
  0x63   : > { %336 = vst.msk [vmem:[#allocation2 + $0x1b0] sm:$0xff] %vm281_vm3, %v4038_v10  ;;  %337 = vst.msk [vmem:[#allocation2 + $0x1b8] sm:$0xff] %vm281_vm3, %v4038_v10  ;;  %v3911_v62 = vld [vmem:[%s4172_s27 + $0x1d8] sm:$0xff]   ;;  %v3912_v63 = vld [vmem:[%s4172_s27 + $0xe0] sm:$0xff]  }
  0x64   : > { %338 = vst.msk [vmem:[#allocation2 + $0x1c0] sm:$0xff] %vm281_vm3, %v4038_v10  ;;  %339 = vst.msk [vmem:[#allocation2 + $0x1c8] sm:$0xff] %vm281_vm3, %v4038_v10  ;;  %v3913_v0 = vld [vmem:[%s4172_s27 + $0x1e0] sm:$0xff]   ;;  %v3914_v1 = vld [vmem:[%s4172_s27 + $0xe8] sm:$0xff]  }
  0x65   : > { %340 = vst.msk [vmem:[#allocation2 + $0x1d0] sm:$0xff] %vm281_vm3, %v4038_v10  ;;  %341 = vst.msk [vmem:[#allocation2 + $0x1d8] sm:$0xff] %vm281_vm3, %v4038_v10  ;;  %v3915_v2 = vld [vmem:[%s4172_s27 + $0x1e8] sm:$0xff]   ;;  %v3916_v3 = vld [vmem:[%s4172_s27 + $0xf0] sm:$0xff]  }
  0x66   : > { %342 = vst.msk [vmem:[#allocation2 + $0x1e0] sm:$0xff] %vm281_vm3, %v4038_v10  ;;  %343 = vst.msk [vmem:[#allocation2 + $0x1e8] sm:$0xff] %vm281_vm3, %v4038_v10  ;;  %v3917_v4 = vld [vmem:[%s4172_s27 + $0x1f0] sm:$0xff]   ;;  %v3918_v5 = vld [vmem:[%s4172_s27 + $0xf8] sm:$0xff]  }
  0x67   : > { %344 = vst.msk [vmem:[#allocation2 + $0x1f0] sm:$0xff] %vm281_vm3, %v4038_v10  ;;  %345 = vst.msk [vmem:[#allocation2 + $0x1f8] sm:$0xff] %vm281_vm3, %v4038_v10  ;;  %3674 = vmatmul.mubr.msk.bf16.gmra.mrb[12].mxu0 %vm1001_vm2, %v3870_v21  ;;  %3738 = vmatmul.mubr.msk.bf16.gmra.mrb[12].mxu1 %vm1001_vm2, %v3871_v22  ;;  %v3919_v6 = vld [vmem:[%s4172_s27 + $0x1f8] sm:$0xff]   ;;  %v412_v7 = vld [vmem:[#allocation2 + $0x10] sm:$0xff] }
  0x68   : > { %346 = vst.msk [vmem:[#allocation2 + $0x200] sm:$0xff] %vm281_vm3, %v4038_v10  ;;  %347 = vst.msk [vmem:[#allocation2 + $0x208] sm:$0xff] %vm281_vm3, %v4038_v10  ;;  %3677 = vmatprep.mubr.msk.bf16.mxu0 %vm1001_vm2, %v3872_v23  ;;  %3741 = vmatprep.mubr.msk.bf16.mxu1 %vm1001_vm2, %v3873_v24  ;;  %v410_v9 = vld [vmem:[#allocation2] sm:$0xff]  ;;  %v413_v13 = vld [vmem:[#allocation2 + $0x18] sm:$0xff] }
  0x69   : > { %348 = vst.msk [vmem:[#allocation2 + $0x210] sm:$0xff] %vm281_vm3, %v4038_v10  ;;  %349 = vst.msk [vmem:[#allocation2 + $0x218] sm:$0xff] %vm281_vm3, %v4038_v10  ;;  %v411_v19 = vld [vmem:[#allocation2 + $0x8] sm:$0xff] }
  0x6a   : > { %350 = vst.msk [vmem:[#allocation2 + $0x220] sm:$0xff] %vm281_vm3, %v4038_v10  ;;  %351 = vst.msk [vmem:[#allocation2 + $0x228] sm:$0xff] %vm281_vm3, %v4038_v10 }
  0x6b   : > { %352 = vst.msk [vmem:[#allocation2 + $0x230] sm:$0xff] %vm281_vm3, %v4038_v10  ;;  %353 = vst.msk [vmem:[#allocation2 + $0x238] sm:$0xff] %vm281_vm3, %v4038_v10 }
  0x6c   : > { %354 = vst.msk [vmem:[#allocation2 + $0x240] sm:$0xff] %vm281_vm3, %v4038_v10  ;;  %355 = vst.msk [vmem:[#allocation2 + $0x248] sm:$0xff] %vm281_vm3, %v4038_v10 }
  0x6d   : > { %356 = vst.msk [vmem:[#allocation2 + $0x250] sm:$0xff] %vm281_vm3, %v4038_v10  ;;  %357 = vst.msk [vmem:[#allocation2 + $0x258] sm:$0xff] %vm281_vm3, %v4038_v10 }
  0x6e   : > { %358 = vst.msk [vmem:[#allocation2 + $0x260] sm:$0xff] %vm281_vm3, %v4038_v10  ;;  %359 = vst.msk [vmem:[#allocation2 + $0x268] sm:$0xff] %vm281_vm3, %v4038_v10 }
  0x6f   : > { %360 = vst.msk [vmem:[#allocation2 + $0x270] sm:$0xff] %vm281_vm3, %v4038_v10  ;;  %361 = vst.msk [vmem:[#allocation2 + $0x278] sm:$0xff] %vm281_vm3, %v4038_v10  ;;  %3678 = vmatmul.mubr.msk.bf16.gmra.mrb[16].mxu0 %vm1001_vm2, %v3874_v25  ;;  %3742 = vmatmul.mubr.msk.bf16.gmra.mrb[16].mxu1 %vm1001_vm2, %v3875_v26  ;;  %v475_v20 = vld [vmem:[#allocation2 + $0x208] sm:$0xff] }
  0x70   : > { %362 = vst.msk [vmem:[#allocation2 + $0x280] sm:$0xff] %vm281_vm3, %v4038_v10  ;;  %363 = vst.msk [vmem:[#allocation2 + $0x288] sm:$0xff] %vm281_vm3, %v4038_v10  ;;  %3681 = vmatprep.mubr.msk.bf16.mxu0 %vm1001_vm2, %v3876_v27  ;;  %3745 = vmatprep.mubr.msk.bf16.mxu1 %vm1001_vm2, %v3877_v28  ;;  %v476_v8 = vld [vmem:[#allocation2 + $0x210] sm:$0xff]  ;;  %v477_v14 = vld [vmem:[#allocation2 + $0x218] sm:$0xff] }
  0x71   : > { %364 = vst.msk [vmem:[#allocation2 + $0x290] sm:$0xff] %vm281_vm3, %v4038_v10  ;;  %365 = vst.msk [vmem:[#allocation2 + $0x298] sm:$0xff] %vm281_vm3, %v4038_v10 }
  0x72   : > { %366 = vst.msk [vmem:[#allocation2 + $0x2a0] sm:$0xff] %vm281_vm3, %v4038_v10  ;;  %367 = vst.msk [vmem:[#allocation2 + $0x2a8] sm:$0xff] %vm281_vm3, %v4038_v10 }
  0x73   : > { %368 = vst.msk [vmem:[#allocation2 + $0x2b0] sm:$0xff] %vm281_vm3, %v4038_v10  ;;  %369 = vst.msk [vmem:[#allocation2 + $0x2b8] sm:$0xff] %vm281_vm3, %v4038_v10 }
  0x74   : > { %370 = vst.msk [vmem:[#allocation2 + $0x2c0] sm:$0xff] %vm281_vm3, %v4038_v10  ;;  %371 = vst.msk [vmem:[#allocation2 + $0x2c8] sm:$0xff] %vm281_vm3, %v4038_v10 }
  0x75   : > { %372 = vst.msk [vmem:[#allocation2 + $0x2d0] sm:$0xff] %vm281_vm3, %v4038_v10  ;;  %373 = vst.msk [vmem:[#allocation2 + $0x2d8] sm:$0xff] %vm281_vm3, %v4038_v10 }
  0x76   : > { %374 = vst.msk [vmem:[#allocation2 + $0x2e0] sm:$0xff] %vm281_vm3, %v4038_v10  ;;  %375 = vst.msk [vmem:[#allocation2 + $0x2e8] sm:$0xff] %vm281_vm3, %v4038_v10 }
  0x77   : > { %376 = vst.msk [vmem:[#allocation2 + $0x2f0] sm:$0xff] %vm281_vm3, %v4038_v10  ;;  %377 = vst.msk [vmem:[#allocation2 + $0x2f8] sm:$0xff] %vm281_vm3, %v4038_v10  ;;  %3682 = vmatmul.mubr.msk.bf16.gmra.mrb[20].mxu0 %vm1001_vm2, %v3878_v29  ;;  %3746 = vmatmul.mubr.msk.bf16.gmra.mrb[20].mxu1 %vm1001_vm2, %v3879_v30 }
  0x78   : > { %378 = vst.msk [vmem:[#allocation2 + $0x300] sm:$0xff] %vm281_vm3, %v4038_v10  ;;  %379 = vst.msk [vmem:[#allocation2 + $0x308] sm:$0xff] %vm281_vm3, %v4038_v10  ;;  %3685 = vmatprep.mubr.msk.bf16.mxu0 %vm1001_vm2, %v3880_v31  ;;  %3749 = vmatprep.mubr.msk.bf16.mxu1 %vm1001_vm2, %v3881_v32  ;;  %v416_v31 = vld [vmem:[#allocation2 + $0x30] sm:$0xff] }
  0x79   : > { %380 = vst.msk [vmem:[#allocation2 + $0x310] sm:$0xff] %vm281_vm3, %v4038_v10  ;;  %381 = vst.msk [vmem:[#allocation2 + $0x318] sm:$0xff] %vm281_vm3, %v4038_v10  ;;  %v480_v32 = vld [vmem:[#allocation2 + $0x230] sm:$0xff] }
  0x7a   : > { %382 = vst.msk [vmem:[#allocation2 + $0x320] sm:$0xff] %vm281_vm3, %v4038_v10  ;;  %383 = vst.msk [vmem:[#allocation2 + $0x328] sm:$0xff] %vm281_vm3, %v4038_v10 }
  0x7b   : > { %384 = vst.msk [vmem:[#allocation2 + $0x330] sm:$0xff] %vm281_vm3, %v4038_v10  ;;  %385 = vst.msk [vmem:[#allocation2 + $0x338] sm:$0xff] %vm281_vm3, %v4038_v10 }
  0x7c   : > { %386 = vst.msk [vmem:[#allocation2 + $0x340] sm:$0xff] %vm281_vm3, %v4038_v10  ;;  %387 = vst.msk [vmem:[#allocation2 + $0x348] sm:$0xff] %vm281_vm3, %v4038_v10 }
  0x7d   : > { %388 = vst.msk [vmem:[#allocation2 + $0x350] sm:$0xff] %vm281_vm3, %v4038_v10  ;;  %389 = vst.msk [vmem:[#allocation2 + $0x358] sm:$0xff] %vm281_vm3, %v4038_v10 }
  0x7e   : > { %390 = vst.msk [vmem:[#allocation2 + $0x360] sm:$0xff] %vm281_vm3, %v4038_v10  ;;  %391 = vst.msk [vmem:[#allocation2 + $0x368] sm:$0xff] %vm281_vm3, %v4038_v10 }
  0x7f   : > { %392 = vst.msk [vmem:[#allocation2 + $0x370] sm:$0xff] %vm281_vm3, %v4038_v10  ;;  %393 = vst.msk [vmem:[#allocation2 + $0x378] sm:$0xff] %vm281_vm3, %v4038_v10  ;;  %3686 = vmatmul.mubr.msk.bf16.gmra.mrb[24].mxu0 %vm1001_vm2, %v3882_v33  ;;  %3750 = vmatmul.mubr.msk.bf16.gmra.mrb[24].mxu1 %vm1001_vm2, %v3883_v34  ;;  %v414_v33 = vld [vmem:[#allocation2 + $0x20] sm:$0xff] }
  0x80   : > { %394 = vst.msk [vmem:[#allocation2 + $0x380] sm:$0xff] %vm281_vm3, %v4038_v10  ;;  %395 = vst.msk [vmem:[#allocation2 + $0x388] sm:$0xff] %vm281_vm3, %v4038_v10  ;;  %3689 = vmatprep.mubr.msk.bf16.mxu0 %vm1001_vm2, %v3884_v35  ;;  %3753 = vmatprep.mubr.msk.bf16.mxu1 %vm1001_vm2, %v3885_v36  ;;  %v478_v34 = vld [vmem:[#allocation2 + $0x220] sm:$0xff] }
  0x81   : > { %396 = vst.msk [vmem:[#allocation2 + $0x390] sm:$0xff] %vm281_vm3, %v4038_v10  ;;  %397 = vst.msk [vmem:[#allocation2 + $0x398] sm:$0xff] %vm281_vm3, %v4038_v10  ;;  %v4594_v35 = vld [vmem:[%s5167_s2] ss:$0 sm:$0xff] }
  0x82   : > { %398 = vst.msk [vmem:[#allocation2 + $0x3a0] sm:$0xff] %vm281_vm3, %v4038_v10  ;;  %399 = vst.msk [vmem:[#allocation2 + $0x3a8] sm:$0xff] %vm281_vm3, %v4038_v10 }
  0x83   : > { %400 = vst.msk [vmem:[#allocation2 + $0x3b0] sm:$0xff] %vm281_vm3, %v4038_v10  ;;  %401 = vst.msk [vmem:[#allocation2 + $0x3b8] sm:$0xff] %vm281_vm3, %v4038_v10 }
  0x84   : > { %402 = vst.msk [vmem:[#allocation2 + $0x3c0] sm:$0xff] %vm281_vm3, %v4038_v10  ;;  %403 = vst.msk [vmem:[#allocation2 + $0x3c8] sm:$0xff] %vm281_vm3, %v4038_v10 }
  0x85   : > { %404 = vst.msk [vmem:[#allocation2 + $0x3d0] sm:$0xff] %vm281_vm3, %v4038_v10  ;;  %405 = vst.msk [vmem:[#allocation2 + $0x3d8] sm:$0xff] %vm281_vm3, %v4038_v10 }
  0x86   : > { %406 = vst.msk [vmem:[#allocation2 + $0x3e0] sm:$0xff] %vm281_vm3, %v4038_v10  ;;  %407 = vst.msk [vmem:[#allocation2 + $0x3e8] sm:$0xff] %vm281_vm3, %v4038_v10 }
  0x87   : > { %408 = vst.msk [vmem:[#allocation2 + $0x3f0] sm:$0xff] %vm281_vm3, %v4038_v10  ;;  %409 = vst.msk [vmem:[#allocation2 + $0x3f8] sm:$0xff] %vm281_vm3, %v4038_v10  ;;  %3690 = vmatmul.mubr.msk.bf16.gmra.mrb[28].mxu0 %vm1001_vm2, %v3886_v37  ;;  %3754 = vmatmul.mubr.msk.bf16.gmra.mrb[28].mxu1 %vm1001_vm2, %v3887_v38  ;;  %v474_v10 = vld [vmem:[#allocation2 + $0x200] sm:$0xff]  ;;  %v417_v38 = vld [vmem:[#allocation2 + $0x38] sm:$0xff] }
  0x88   : > { %3693 = vmatprep.mubr.msk.bf16.mxu0 %vm1001_vm2, %v3888_v39  ;;  %3757 = vmatprep.mubr.msk.bf16.mxu1 %vm1001_vm2, %v3889_v40  ;;  %v481_v39 = vld [vmem:[#allocation2 + $0x238] sm:$0xff] }
  0x8f   : > { %3694 = vmatmul.mubr.msk.bf16.gmra.mrb[32].mxu0 %vm1001_vm2, %v3890_v41  ;;  %3758 = vmatmul.mubr.msk.bf16.gmra.mrb[32].mxu1 %vm1001_vm2, %v3891_v42 }
  0x90   : > { %3697 = vmatprep.mubr.msk.bf16.mxu0 %vm1001_vm2, %v3892_v43  ;;  %3761 = vmatprep.mubr.msk.bf16.mxu1 %vm1001_vm2, %v3893_v44  ;;  %v415_v44 = vld [vmem:[#allocation2 + $0x28] sm:$0xff] }
  0x97   : > { %3698 = vmatmul.mubr.msk.bf16.gmra.mrb[36].mxu0 %vm1001_vm2, %v3894_v45  ;;  %3762 = vmatmul.mubr.msk.bf16.gmra.mrb[36].mxu1 %vm1001_vm2, %v3895_v46  ;;  %v479_v45 = vld [vmem:[#allocation2 + $0x228] sm:$0xff] }
  0x98   : > { %3701 = vmatprep.mubr.msk.bf16.mxu0 %vm1001_vm2, %v3896_v47  ;;  %3765 = vmatprep.mubr.msk.bf16.mxu1 %vm1001_vm2, %v3897_v48 }
  0x9f   : > { %3702 = vmatmul.mubr.msk.bf16.gmra.mrb[40].mxu0 %vm1001_vm2, %v3898_v49  ;;  %3766 = vmatmul.mubr.msk.bf16.gmra.mrb[40].mxu1 %vm1001_vm2, %v3899_v50 }
  0xa0   : > { %3705 = vmatprep.mubr.msk.bf16.mxu0 %vm1001_vm2, %v3900_v51  ;;  %3769 = vmatprep.mubr.msk.bf16.mxu1 %vm1001_vm2, %v3901_v52 }
  0xa7   : > { %3706 = vmatmul.mubr.msk.bf16.gmra.mrb[44].mxu0 %vm1001_vm2, %v3902_v53  ;;  %3770 = vmatmul.mubr.msk.bf16.gmra.mrb[44].mxu1 %vm1001_vm2, %v3903_v54 }
  0xa8   : > { %3709 = vmatprep.mubr.msk.bf16.mxu0 %vm1001_vm2, %v3904_v55  ;;  %3773 = vmatprep.mubr.msk.bf16.mxu1 %vm1001_vm2, %v3905_v56 }
  0xaf   : > { %3710 = vmatmul.mubr.msk.bf16.gmra.mrb[48].mxu0 %vm1001_vm2, %v3906_v57  ;;  %3774 = vmatmul.mubr.msk.bf16.gmra.mrb[48].mxu1 %vm1001_vm2, %v3907_v58 }
  0xb0   : > { %3713 = vmatprep.mubr.msk.bf16.mxu0 %vm1001_vm2, %v3908_v59  ;;  %3777 = vmatprep.mubr.msk.bf16.mxu1 %vm1001_vm2, %v3909_v60 }
  0xb7   : > { %3714 = vmatmul.mubr.msk.bf16.gmra.mrb[52].mxu0 %vm1001_vm2, %v3910_v61  ;;  %3778 = vmatmul.mubr.msk.bf16.gmra.mrb[52].mxu1 %vm1001_vm2, %v3911_v62 }
  0xb8   : > { %3717 = vmatprep.mubr.msk.bf16.mxu0 %vm1001_vm2, %v3912_v63  ;;  %3781 = vmatprep.mubr.msk.bf16.mxu1 %vm1001_vm2, %v3913_v0 }
  0xbf   : > { %3718 = vmatmul.mubr.msk.bf16.gmra.mrb[56].mxu0 %vm1001_vm2, %v3914_v1  ;;  %3782 = vmatmul.mubr.msk.bf16.gmra.mrb[56].mxu1 %vm1001_vm2, %v3915_v2 }
  0xc0   : > { %3721 = vmatprep.mubr.msk.bf16.mxu0 %vm1001_vm2, %v3916_v3  ;;  %3785 = vmatprep.mubr.msk.bf16.mxu1 %vm1001_vm2, %v3917_v4 }
  0xc7   : > { %3722 = vmatmul.mubr.msk.bf16.gmra.mrb[60].mxu0 %vm1001_vm2, %v3918_v5  ;;  %3786 = vmatmul.mubr.msk.bf16.gmra.mrb[60].mxu1 %vm1001_vm2, %v3919_v6 }
 0x122   : > { %v3663_v11 = vpop.f32.mrb[0].mxu0  ;;  %v3727_v12 = vpop.f32.mrb[0].mxu1 }
 0x123   : > { %v1748_v15 = vadd.f32 %v3663_v11, %v412_v7  ;;  %v1812_v16 = vadd.f32 %v3727_v12, %v476_v8  ;;  %v1235_v17 = vpop.f32.mrb[1].mxu0  ;;  %v1491_v18 = vpop.f32.mrb[1].mxu1  ;;  %v420_v12 = vld [vmem:[#allocation2 + $0x50] sm:$0xff] }
 0x124   : > { %v1746_v21 = vadd.f32 %v1235_v17, %v410_v9  ;;  %v1810_v22 = vadd.f32 %v1491_v18, %v474_v10  ;;  %v3664_v23 = vpop.f32.mrb[2].mxu0  ;;  %v3728_v24 = vpop.f32.mrb[2].mxu1  ;;  %v418_v18 = vld [vmem:[#allocation2 + $0x40] sm:$0xff] }
 0x125   : > { %1877 = vst.msk [vmem:[#allocation2 + $0x10] sm:$0xff] %vm281_vm3, %v1748_v15  ;;  %1941 = vst.msk [vmem:[#allocation2 + $0x210] sm:$0xff] %vm281_vm3, %v1812_v16  ;;  %v1749_v25 = vadd.f32 %v3664_v23, %v413_v13  ;;  %v1813_v26 = vadd.f32 %v3728_v24, %v477_v14  ;;  %v1238_v27 = vpop.f32.mrb[3].mxu0  ;;  %v1494_v28 = vpop.f32.mrb[3].mxu1  ;;  %v484_v13 = vld [vmem:[#allocation2 + $0x250] sm:$0xff] }
 0x126   : > { %1875 = vst.msk [vmem:[#allocation2] sm:$0xff] %vm281_vm3, %v1746_v21  ;;  %1939 = vst.msk [vmem:[#allocation2 + $0x200] sm:$0xff] %vm281_vm3, %v1810_v22  ;;  %v1747_v29 = vadd.f32 %v1238_v27, %v411_v19  ;;  %v1811_v30 = vadd.f32 %v1494_v28, %v475_v20  ;;  %v482_v19 = vld [vmem:[#allocation2 + $0x240] sm:$0xff]  ;;  %v485_v27 = vld [vmem:[#allocation2 + $0x258] sm:$0xff] }
 0x127   : > { %1878 = vst.msk [vmem:[#allocation2 + $0x18] sm:$0xff] %vm281_vm3, %v1749_v25  ;;  %1942 = vst.msk [vmem:[#allocation2 + $0x218] sm:$0xff] %vm281_vm3, %v1813_v26  ;;  %v421_v26 = vld [vmem:[#allocation2 + $0x58] sm:$0xff] }
 0x128   : > { %1876 = vst.msk [vmem:[#allocation2 + $0x8] sm:$0xff] %vm281_vm3, %v1747_v29  ;;  %1940 = vst.msk [vmem:[#allocation2 + $0x208] sm:$0xff] %vm281_vm3, %v1811_v30 }
 0x12a   : > { %v3667_v36 = vpop.f32.mrb[4].mxu0  ;;  %v3731_v37 = vpop.f32.mrb[4].mxu1 }
 0x12b   : > { %v1752_v40 = vadd.f32 %v3667_v36, %v416_v31  ;;  %v1816_v41 = vadd.f32 %v3731_v37, %v480_v32  ;;  %v1251_v42 = vpop.f32.mrb[5].mxu0  ;;  %v1507_v43 = vpop.f32.mrb[5].mxu1  ;;  %v483_v36 = vld [vmem:[#allocation2 + $0x248] sm:$0xff] }
 0x12c   : > { %v2008_v46 = vld [vmem:[#allocation2 + $0x10] sm:$0xff]  ;;  %v1750_v48 = vadd.f32 %v1251_v42, %v414_v33  ;;  %v1814_v49 = vadd.f32 %v1507_v43, %v478_v34  ;;  %v3668_v50 = vpop.f32.mrb[6].mxu0  ;;  %v3732_v51 = vpop.f32.mrb[6].mxu1  ;;  %v419_v34 = vld [vmem:[#allocation2 + $0x48] sm:$0xff] }
 0x12d   : > { %v2072_v47 = vld [vmem:[#allocation2 + $0x210] sm:$0xff]  ;;  %v2143_v52 = vadd.f32 %v4594_v35, %v2008_v46  ;;  %v2006_v54 = vld [vmem:[#allocation2] sm:$0xff]  ;;  %1881 = vst.msk [vmem:[#allocation2 + $0x30] sm:$0xff] %vm281_vm3, %v1752_v40  ;;  %1945 = vst.msk [vmem:[#allocation2 + $0x230] sm:$0xff] %vm281_vm3, %v1816_v41  ;;  %v1753_v56 = vadd.f32 %v3668_v50, %v417_v38  ;;  %v1817_v57 = vadd.f32 %v3732_v51, %v481_v39  ;;  %v1254_v58 = vpop.f32.mrb[7].mxu0  ;;  %v1510_v59 = vpop.f32.mrb[7].mxu1 }
 0x12e   : > { %v2207_v53 = vadd.f32 %v4594_v35, %v2072_v47  ;;  %v2070_v55 = vld [vmem:[#allocation2 + $0x200] sm:$0xff]  ;;  %v2141_v60 = vadd.f32 %v4594_v35, %v2006_v54  ;;  %v2009_v62 = vld [vmem:[#allocation2 + $0x18] sm:$0xff]  ;;  %1879 = vst.msk [vmem:[#allocation2 + $0x20] sm:$0xff] %vm281_vm3, %v1750_v48  ;;  %1943 = vst.msk [vmem:[#allocation2 + $0x220] sm:$0xff] %vm281_vm3, %v1814_v49  ;;  %v1751_v0 = vadd.f32 %v1254_v58, %v415_v44 }
 0x12f   : > { %v2205_v61 = vadd.f32 %v4594_v35, %v2070_v55  ;;  %v2073_v63 = vld [vmem:[#allocation2 + $0x218] sm:$0xff]  ;;  %v1815_v1 = vadd.f32 %v1510_v59, %v479_v45  ;;  %v2271_v2 = vmax.f32 %v2143_v52, 0.0  ;;  %v2144_v4 = vadd.f32 %v4594_v35, %v2009_v62  ;;  %v2007_v6 = vld [vmem:[#allocation2 + $0x8] sm:$0xff]  ;;  %1882 = vst.msk [vmem:[#allocation2 + $0x38] sm:$0xff] %vm281_vm3, %v1753_v56  ;;  %1946 = vst.msk [vmem:[#allocation2 + $0x238] sm:$0xff] %vm281_vm3, %v1817_v57 }
 0x130   : > { %v2335_v3 = vmax.f32 %v2207_v53, 0.0  ;;  %v2208_v5 = vadd.f32 %v4594_v35, %v2073_v63  ;;  %v2071_v7 = vld [vmem:[#allocation2 + $0x208] sm:$0xff]  ;;  %v2269_v8 = vmax.f32 %v2141_v60, 0.0  ;;  %v2142_v10 = vadd.f32 %v4594_v35, %v2007_v6  ;;  %1880 = vst.msk [vmem:[#allocation2 + $0x28] sm:$0xff] %vm281_vm3, %v1751_v0  ;;  %v488_v6 = vld [vmem:[#allocation2 + $0x270] sm:$0xff] }
 0x131   : > { %v2333_v9 = vmax.f32 %v2205_v61, 0.0  ;;  %v2206_v11 = vadd.f32 %v4594_v35, %v2071_v7  ;;  %1944 = vst.msk [vmem:[#allocation2 + $0x228] sm:$0xff] %vm281_vm3, %v1815_v1  ;;  %v3464_v14 = vpack.c.bf16 %v2271_v2, %v2271_v2  ;;  %v2272_v16 = vmax.f32 %v2144_v4, 0.0 }
 0x132   : > { %v3528_v15 = vpack.c.bf16 %v2335_v3, %v2335_v3  ;;  %v2336_v17 = vmax.f32 %v2208_v5, 0.0  ;;  %v3462_v20 = vpack.c.bf16 %v2269_v8, %v2269_v8  ;;  %v2270_v22 = vmax.f32 %v2142_v10, 0.0  ;;  %v3671_v24 = vpop.f32.mrb[8].mxu0  ;;  %v3735_v25 = vpop.f32.mrb[8].mxu1  ;;  %v424_v5 = vld [vmem:[#allocation2 + $0x70] sm:$0xff] }
 0x133   : > { %v3526_v21 = vpack.c.bf16 %v2333_v9, %v2333_v9  ;;  %v2334_v23 = vmax.f32 %v2206_v11, 0.0  ;;  %2912 = vst.msk [vmem:[%s4614_s29 + $0x8] sm:$0xf] %vm2909_vm4, %v3464_v14  ;;  %v3465_v28 = vpack.c.bf16 %v2272_v16, %v2272_v16  ;;  %v1756_v30 = vadd.f32 %v3671_v24, %v420_v12  ;;  %v1267_v32 = vpop.f32.mrb[9].mxu0  ;;  %v1523_v33 = vpop.f32.mrb[9].mxu1  ;;  %v422_v11 = vld [vmem:[#allocation2 + $0x60] sm:$0xff] }
 0x134   : > { %2976 = vst.msk [vmem:[%s4614_s29 + $0x108] sm:$0xf] %vm2909_vm4, %v3528_v15  ;;  %v3529_v29 = vpack.c.bf16 %v2336_v17, %v2336_v17  ;;  %v1820_v31 = vadd.f32 %v3735_v25, %v484_v13  ;;  %2910 = vst.msk [vmem:[%s4614_s29] sm:$0xf] %vm2909_vm4, %v3462_v20  ;;  %v3463_v37 = vpack.c.bf16 %v2270_v22, %v2270_v22  ;;  %v2012_v39 = vld [vmem:[#allocation2 + $0x30] sm:$0xff]  ;;  %v3672_v43 = vpop.f32.mrb[10].mxu0 }
 0x135   : > { %2974 = vst.msk [vmem:[%s4614_s29 + $0x100] sm:$0xf] %vm2909_vm4, %v3526_v21  ;;  %v3527_v38 = vpack.c.bf16 %v2334_v23, %v2334_v23  ;;  %v2076_v40 = vld [vmem:[#allocation2 + $0x230] sm:$0xff]  ;;  %v1754_v41 = vadd.f32 %v1267_v32, %v418_v18  ;;  %v1818_v42 = vadd.f32 %v1523_v33, %v482_v19  ;;  %v3736_v44 = vpop.f32.mrb[10].mxu1  ;;  %2913 = vst.msk [vmem:[%s4614_s29 + $0xc] sm:$0xf] %vm2909_vm4, %v3465_v28 }
 0x136   : > { %2977 = vst.msk [vmem:[%s4614_s29 + $0x10c] sm:$0xf] %vm2909_vm4, %v3529_v29  ;;  %v2147_v45 = vadd.f32 %v4594_v35, %v2012_v39  ;;  %v2211_v46 = vadd.f32 %v4594_v35, %v2076_v40  ;;  %v2010_v47 = vld [vmem:[#allocation2 + $0x20] sm:$0xff]  ;;  %v1757_v49 = vadd.f32 %v3672_v43, %v421_v26  ;;  %v1821_v50 = vadd.f32 %v3736_v44, %v485_v27  ;;  %v1270_v51 = vpop.f32.mrb[11].mxu0  ;;  %v1526_v52 = vpop.f32.mrb[11].mxu1  ;;  %v2013_v55 = vld [vmem:[#allocation2 + $0x38] sm:$0xff] }
 0x137   : > { %v2074_v48 = vld [vmem:[#allocation2 + $0x220] sm:$0xff]  ;;  %1885 = vst.msk [vmem:[#allocation2 + $0x50] sm:$0xff] %vm281_vm3, %v1756_v30  ;;  %1949 = vst.msk [vmem:[#allocation2 + $0x250] sm:$0xff] %vm281_vm3, %v1820_v31  ;;  %v2145_v53 = vadd.f32 %v4594_v35, %v2010_v47  ;;  %v2077_v56 = vld [vmem:[#allocation2 + $0x238] sm:$0xff]  ;;  %v1755_v57 = vadd.f32 %v1270_v51, %v419_v34  ;;  %v1819_v58 = vadd.f32 %v1526_v52, %v483_v36 }
 0x138   : > { %2911 = vst.msk [vmem:[%s4614_s29 + $0x4] sm:$0xf] %vm2909_vm4, %v3463_v37  ;;  %2975 = vst.msk [vmem:[%s4614_s29 + $0x104] sm:$0xf] %vm2909_vm4, %v3527_v38  ;;  %v2209_v54 = vadd.f32 %v4594_v35, %v2074_v48  ;;  %v2275_v59 = vmax.f32 %v2147_v45, 0.0  ;;  %v2339_v60 = vmax.f32 %v2211_v46, 0.0  ;;  %v2148_v61 = vadd.f32 %v4594_v35, %v2013_v55 }
 0x139   : > { %1883 = vst.msk [vmem:[#allocation2 + $0x40] sm:$0xff] %vm281_vm3, %v1754_v41  ;;  %1947 = vst.msk [vmem:[#allocation2 + $0x240] sm:$0xff] %vm281_vm3, %v1818_v42  ;;  %v2212_v62 = vadd.f32 %v4594_v35, %v2077_v56  ;;  %v2011_v63 = vld [vmem:[#allocation2 + $0x28] sm:$0xff]  ;;  %v2273_v1 = vmax.f32 %v2145_v53, 0.0  ;;  %v486_v12 = vld [vmem:[#allocation2 + $0x260] sm:$0xff] }
 0x13a   : > { %v2075_v0 = vld [vmem:[#allocation2 + $0x228] sm:$0xff]  ;;  %1886 = vst.msk [vmem:[#allocation2 + $0x58] sm:$0xff] %vm281_vm3, %v1757_v49  ;;  %1950 = vst.msk [vmem:[#allocation2 + $0x258] sm:$0xff] %vm281_vm3, %v1821_v50  ;;  %v2337_v2 = vmax.f32 %v2209_v54, 0.0  ;;  %v2146_v3 = vadd.f32 %v4594_v35, %v2011_v63  ;;  %v3468_v7 = vpack.c.bf16 %v2275_v59, %v2275_v59  ;;  %v3532_v8 = vpack.c.bf16 %v2339_v60, %v2339_v60  ;;  %v3675_v17 = vpop.f32.mrb[12].mxu0  ;;  %v3739_v18 = vpop.f32.mrb[12].mxu1 }
 0x13b   : > { %v2210_v4 = vadd.f32 %v4594_v35, %v2075_v0  ;;  %1884 = vst.msk [vmem:[#allocation2 + $0x48] sm:$0xff] %vm281_vm3, %v1755_v57  ;;  %1948 = vst.msk [vmem:[#allocation2 + $0x248] sm:$0xff] %vm281_vm3, %v1819_v58  ;;  %v2276_v9 = vmax.f32 %v2148_v61, 0.0  ;;  %v2340_v10 = vmax.f32 %v2212_v62, 0.0  ;;  %v3466_v13 = vpack.c.bf16 %v2273_v1, %v2273_v1  ;;  %v425_v19 = vld [vmem:[#allocation2 + $0x78] sm:$0xff]  ;;  %v1283_v25 = vpop.f32.mrb[13].mxu0 }
 0x13c   : > { %v3530_v14 = vpack.c.bf16 %v2337_v2, %v2337_v2  ;;  %v2274_v15 = vmax.f32 %v2146_v3, 0.0  ;;  %v489_v20 = vld [vmem:[#allocation2 + $0x278] sm:$0xff]  ;;  %2916 = vst.msk [vmem:[%s4614_s29 + $0x18] sm:$0xf] %vm2909_vm4, %v3468_v7  ;;  %2980 = vst.msk [vmem:[%s4614_s29 + $0x118] sm:$0xf] %vm2909_vm4, %v3532_v8  ;;  %v1760_v23 = vadd.f32 %v3675_v17, %v424_v5  ;;  %v1824_v24 = vadd.f32 %v3739_v18, %v488_v6 }
 0x13d   : > { %v2338_v16 = vmax.f32 %v2210_v4, 0.0  ;;  %v3469_v21 = vpack.c.bf16 %v2276_v9, %v2276_v9  ;;  %v3533_v22 = vpack.c.bf16 %v2340_v10, %v2340_v10  ;;  %v1539_v26 = vpop.f32.mrb[13].mxu1  ;;  %v423_v27 = vld [vmem:[#allocation2 + $0x68] sm:$0xff]  ;;  %2914 = vst.msk [vmem:[%s4614_s29 + $0x10] sm:$0xf] %vm2909_vm4, %v3466_v13  ;;  %v1758_v33 = vadd.f32 %v1283_v25, %v422_v11  ;;  %v3676_v36 = vpop.f32.mrb[14].mxu0 }
 0x13e   : > { %v487_v28 = vld [vmem:[#allocation2 + $0x268] sm:$0xff]  ;;  %2978 = vst.msk [vmem:[%s4614_s29 + $0x110] sm:$0xf] %vm2909_vm4, %v3530_v14  ;;  %v3467_v29 = vpack.c.bf16 %v2274_v15, %v2274_v15  ;;  %v2016_v31 = vld [vmem:[#allocation2 + $0x50] sm:$0xff]  ;;  %v1822_v34 = vadd.f32 %v1539_v26, %v486_v12  ;;  %v3740_v37 = vpop.f32.mrb[14].mxu1  ;;  %v1761_v42 = vadd.f32 %v3676_v36, %v425_v19  ;;  %v1286_v44 = vpop.f32.mrb[15].mxu0 }
 0x13f   : > { %v3531_v30 = vpack.c.bf16 %v2338_v16, %v2338_v16  ;;  %v2080_v32 = vld [vmem:[#allocation2 + $0x250] sm:$0xff]  ;;  %2917 = vst.msk [vmem:[%s4614_s29 + $0x1c] sm:$0xf] %vm2909_vm4, %v3469_v21  ;;  %2981 = vst.msk [vmem:[%s4614_s29 + $0x11c] sm:$0xf] %vm2909_vm4, %v3533_v22  ;;  %v2151_v38 = vadd.f32 %v4594_v35, %v2016_v31  ;;  %v1825_v43 = vadd.f32 %v3740_v37, %v489_v20  ;;  %v1542_v45 = vpop.f32.mrb[15].mxu1 }
 0x140   : > { %v2215_v39 = vadd.f32 %v4594_v35, %v2080_v32  ;;  %v2014_v40 = vld [vmem:[#allocation2 + $0x40] sm:$0xff]  ;;  %1889 = vst.msk [vmem:[#allocation2 + $0x70] sm:$0xff] %vm281_vm3, %v1760_v23  ;;  %1953 = vst.msk [vmem:[#allocation2 + $0x270] sm:$0xff] %vm281_vm3, %v1824_v24  ;;  %v1759_v50 = vadd.f32 %v1286_v44, %v423_v27  ;;  %v1823_v51 = vadd.f32 %v1542_v45, %v487_v28  ;;  %v428_v62 = vld [vmem:[#allocation2 + $0x90] sm:$0xff] }
 0x141   : > { %v2078_v41 = vld [vmem:[#allocation2 + $0x240] sm:$0xff]  ;;  %2915 = vst.msk [vmem:[%s4614_s29 + $0x14] sm:$0xf] %vm2909_vm4, %v3467_v29  ;;  %2979 = vst.msk [vmem:[%s4614_s29 + $0x114] sm:$0xf] %vm2909_vm4, %v3531_v30  ;;  %v2149_v46 = vadd.f32 %v4594_v35, %v2014_v40  ;;  %v2017_v48 = vld [vmem:[#allocation2 + $0x58] sm:$0xff] }
 0x142   : > { %v2213_v47 = vadd.f32 %v4594_v35, %v2078_v41  ;;  %v2081_v49 = vld [vmem:[#allocation2 + $0x258] sm:$0xff]  ;;  %1887 = vst.msk [vmem:[#allocation2 + $0x60] sm:$0xff] %vm281_vm3, %v1758_v33  ;;  %1951 = vst.msk [vmem:[#allocation2 + $0x260] sm:$0xff] %vm281_vm3, %v1822_v34  ;;  %v2279_v52 = vmax.f32 %v2151_v38, 0.0  ;;  %v2343_v53 = vmax.f32 %v2215_v39, 0.0  ;;  %v2152_v54 = vadd.f32 %v4594_v35, %v2017_v48  ;;  %v2015_v56 = vld [vmem:[#allocation2 + $0x48] sm:$0xff] }
 0x143   : > { %v2216_v55 = vadd.f32 %v4594_v35, %v2081_v49  ;;  %v2079_v57 = vld [vmem:[#allocation2 + $0x248] sm:$0xff]  ;;  %1890 = vst.msk [vmem:[#allocation2 + $0x78] sm:$0xff] %vm281_vm3, %v1761_v42  ;;  %1954 = vst.msk [vmem:[#allocation2 + $0x278] sm:$0xff] %vm281_vm3, %v1825_v43  ;;  %v2277_v58 = vmax.f32 %v2149_v46, 0.0  ;;  %v2150_v60 = vadd.f32 %v4594_v35, %v2015_v56  ;;  %v492_v63 = vld [vmem:[#allocation2 + $0x290] sm:$0xff]  ;;  %v3679_v10 = vpop.f32.mrb[16].mxu0 }
 0x144   : > { %v2341_v59 = vmax.f32 %v2213_v47, 0.0  ;;  %v2214_v61 = vadd.f32 %v4594_v35, %v2079_v57  ;;  %1888 = vst.msk [vmem:[#allocation2 + $0x68] sm:$0xff] %vm281_vm3, %v1759_v50  ;;  %1952 = vst.msk [vmem:[#allocation2 + $0x268] sm:$0xff] %vm281_vm3, %v1823_v51  ;;  %v3472_v0 = vpack.c.bf16 %v2279_v52, %v2279_v52  ;;  %v3536_v1 = vpack.c.bf16 %v2343_v53, %v2343_v53  ;;  %v426_v4 = vld [vmem:[#allocation2 + $0x80] sm:$0xff]  ;;  %v3743_v11 = vpop.f32.mrb[16].mxu1  ;;  %v429_v12 = vld [vmem:[#allocation2 + $0x98] sm:$0xff] }
 0x145   : > { %v2280_v2 = vmax.f32 %v2152_v54, 0.0  ;;  %v2344_v3 = vmax.f32 %v2216_v55, 0.0  ;;  %v490_v5 = vld [vmem:[#allocation2 + $0x280] sm:$0xff]  ;;  %v3470_v6 = vpack.c.bf16 %v2277_v58, %v2277_v58  ;;  %v2278_v8 = vmax.f32 %v2150_v60, 0.0  ;;  %v493_v13 = vld [vmem:[#allocation2 + $0x298] sm:$0xff]  ;;  %v1299_v18 = vpop.f32.mrb[17].mxu0 }
 0x146   : > { %v3534_v7 = vpack.c.bf16 %v2341_v59, %v2341_v59  ;;  %v2342_v9 = vmax.f32 %v2214_v61, 0.0  ;;  %2920 = vst.msk [vmem:[%s4614_s29 + $0x28] sm:$0xf] %vm2909_vm4, %v3472_v0  ;;  %2984 = vst.msk [vmem:[%s4614_s29 + $0x128] sm:$0xf] %vm2909_vm4, %v3536_v1  ;;  %v1764_v16 = vadd.f32 %v3679_v10, %v428_v62  ;;  %v1828_v17 = vadd.f32 %v3743_v11, %v492_v63  ;;  %v1555_v19 = vpop.f32.mrb[17].mxu1 }
 0x147   : > { %v3473_v14 = vpack.c.bf16 %v2280_v2, %v2280_v2  ;;  %v3537_v15 = vpack.c.bf16 %v2344_v3, %v2344_v3  ;;  %v427_v20 = vld [vmem:[#allocation2 + $0x88] sm:$0xff]  ;;  %2918 = vst.msk [vmem:[%s4614_s29 + $0x20] sm:$0xf] %vm2909_vm4, %v3470_v6  ;;  %v3471_v22 = vpack.c.bf16 %v2278_v8, %v2278_v8  ;;  %v2020_v24 = vld [vmem:[#allocation2 + $0x70] sm:$0xff]  ;;  %v1762_v26 = vadd.f32 %v1299_v18, %v426_v4  ;;  %v3680_v28 = vpop.f32.mrb[18].mxu0  ;;  %v3744_v29 = vpop.f32.mrb[18].mxu1 }
 0x148   : > { %v491_v21 = vld [vmem:[#allocation2 + $0x288] sm:$0xff]  ;;  %2982 = vst.msk [vmem:[%s4614_s29 + $0x120] sm:$0xf] %vm2909_vm4, %v3534_v7  ;;  %v3535_v23 = vpack.c.bf16 %v2342_v9, %v2342_v9  ;;  %v2084_v25 = vld [vmem:[#allocation2 + $0x270] sm:$0xff]  ;;  %v1826_v27 = vadd.f32 %v1555_v19, %v490_v5  ;;  %v2155_v30 = vadd.f32 %v4594_v35, %v2020_v24  ;;  %v1765_v34 = vadd.f32 %v3680_v28, %v429_v12  ;;  %v1302_v37 = vpop.f32.mrb[19].mxu0  ;;  %v1558_v38 = vpop.f32.mrb[19].mxu1 }
 0x149   : > { %2921 = vst.msk [vmem:[%s4614_s29 + $0x2c] sm:$0xf] %vm2909_vm4, %v3473_v14  ;;  %2985 = vst.msk [vmem:[%s4614_s29 + $0x12c] sm:$0xf] %vm2909_vm4, %v3537_v15  ;;  %v2219_v31 = vadd.f32 %v4594_v35, %v2084_v25  ;;  %v2018_v32 = vld [vmem:[#allocation2 + $0x60] sm:$0xff]  ;;  %v1829_v36 = vadd.f32 %v3744_v29, %v493_v13  ;;  %v1763_v43 = vadd.f32 %v1302_v37, %v427_v20  ;;  %v432_v55 = vld [vmem:[#allocation2 + $0xb0] sm:$0xff] }
 0x14a   : > { %v2082_v33 = vld [vmem:[#allocation2 + $0x260] sm:$0xff]  ;;  %1893 = vst.msk [vmem:[#allocation2 + $0x90] sm:$0xff] %vm281_vm3, %v1764_v16  ;;  %1957 = vst.msk [vmem:[#allocation2 + $0x290] sm:$0xff] %vm281_vm3, %v1828_v17  ;;  %v2153_v39 = vadd.f32 %v4594_v35, %v2018_v32  ;;  %v2021_v41 = vld [vmem:[#allocation2 + $0x78] sm:$0xff]  ;;  %v1827_v44 = vadd.f32 %v1558_v38, %v491_v21  ;;  %v2283_v45 = vmax.f32 %v2155_v30, 0.0  ;;  %v3683_v3 = vpop.f32.mrb[20].mxu0 }
 0x14b   : > { %2919 = vst.msk [vmem:[%s4614_s29 + $0x24] sm:$0xf] %vm2909_vm4, %v3471_v22  ;;  %2983 = vst.msk [vmem:[%s4614_s29 + $0x124] sm:$0xf] %vm2909_vm4, %v3535_v23  ;;  %v2217_v40 = vadd.f32 %v4594_v35, %v2082_v33  ;;  %v2085_v42 = vld [vmem:[#allocation2 + $0x278] sm:$0xff]  ;;  %v2347_v46 = vmax.f32 %v2219_v31, 0.0  ;;  %v2156_v47 = vadd.f32 %v4594_v35, %v2021_v41  ;;  %v1768_v9 = vadd.f32 %v3683_v3, %v432_v55 }
 0x14c   : > { %1891 = vst.msk [vmem:[#allocation2 + $0x80] sm:$0xff] %vm281_vm3, %v1762_v26  ;;  %1955 = vst.msk [vmem:[#allocation2 + $0x280] sm:$0xff] %vm281_vm3, %v1826_v27  ;;  %v2220_v48 = vadd.f32 %v4594_v35, %v2085_v42  ;;  %v2019_v49 = vld [vmem:[#allocation2 + $0x68] sm:$0xff]  ;;  %v2281_v51 = vmax.f32 %v2153_v39, 0.0  ;;  %v496_v56 = vld [vmem:[#allocation2 + $0x2b0] sm:$0xff]  ;;  %v3476_v57 = vpack.c.bf16 %v2283_v45, %v2283_v45  ;;  %v3747_v4 = vpop.f32.mrb[20].mxu1 }
 0x14d   : > { %v2083_v50 = vld [vmem:[#allocation2 + $0x268] sm:$0xff]  ;;  %1894 = vst.msk [vmem:[#allocation2 + $0x98] sm:$0xff] %vm281_vm3, %v1765_v34  ;;  %1958 = vst.msk [vmem:[#allocation2 + $0x298] sm:$0xff] %vm281_vm3, %v1829_v36  ;;  %v2345_v52 = vmax.f32 %v2217_v40, 0.0  ;;  %v2154_v53 = vadd.f32 %v4594_v35, %v2019_v49  ;;  %v3540_v58 = vpack.c.bf16 %v2347_v46, %v2347_v46  ;;  %v2284_v59 = vmax.f32 %v2156_v47, 0.0  ;;  %v430_v61 = vld [vmem:[#allocation2 + $0xa0] sm:$0xff] }
 0x14e   : > { %v2218_v54 = vadd.f32 %v4594_v35, %v2083_v50  ;;  %1892 = vst.msk [vmem:[#allocation2 + $0x88] sm:$0xff] %vm281_vm3, %v1763_v43  ;;  %1956 = vst.msk [vmem:[#allocation2 + $0x288] sm:$0xff] %vm281_vm3, %v1827_v44  ;;  %v2348_v60 = vmax.f32 %v2220_v48, 0.0  ;;  %v494_v62 = vld [vmem:[#allocation2 + $0x2a0] sm:$0xff]  ;;  %v3474_v63 = vpack.c.bf16 %v2281_v51, %v2281_v51  ;;  %v433_v5 = vld [vmem:[#allocation2 + $0xb8] sm:$0xff]  ;;  %v1832_v10 = vadd.f32 %v3747_v4, %v496_v56  ;;  %v1315_v11 = vpop.f32.mrb[21].mxu0 }
 0x14f   : > { %v3538_v0 = vpack.c.bf16 %v2345_v52, %v2345_v52  ;;  %v2282_v1 = vmax.f32 %v2154_v53, 0.0  ;;  %v497_v6 = vld [vmem:[#allocation2 + $0x2b8] sm:$0xff]  ;;  %2924 = vst.msk [vmem:[%s4614_s29 + $0x38] sm:$0xf] %vm2909_vm4, %v3476_v57  ;;  %2988 = vst.msk [vmem:[%s4614_s29 + $0x138] sm:$0xf] %vm2909_vm4, %v3540_v58  ;;  %v3477_v7 = vpack.c.bf16 %v2284_v59, %v2284_v59  ;;  %v1766_v19 = vadd.f32 %v1315_v11, %v430_v61 }
 0x150   : > { %v2346_v2 = vmax.f32 %v2218_v54, 0.0  ;;  %v3541_v8 = vpack.c.bf16 %v2348_v60, %v2348_v60  ;;  %v1571_v12 = vpop.f32.mrb[21].mxu1  ;;  %v431_v13 = vld [vmem:[#allocation2 + $0xa8] sm:$0xff]  ;;  %2922 = vst.msk [vmem:[%s4614_s29 + $0x30] sm:$0xf] %vm2909_vm4, %v3474_v63  ;;  %v3684_v21 = vpop.f32.mrb[22].mxu0 }
 0x151   : > { %v495_v14 = vld [vmem:[#allocation2 + $0x2a8] sm:$0xff]  ;;  %2986 = vst.msk [vmem:[%s4614_s29 + $0x130] sm:$0xf] %vm2909_vm4, %v3538_v0  ;;  %v3475_v15 = vpack.c.bf16 %v2282_v1, %v2282_v1  ;;  %v2024_v17 = vld [vmem:[#allocation2 + $0x90] sm:$0xff]  ;;  %v1830_v20 = vadd.f32 %v1571_v12, %v494_v62  ;;  %v3748_v22 = vpop.f32.mrb[22].mxu1  ;;  %v1769_v27 = vadd.f32 %v3684_v21, %v433_v5  ;;  %v1318_v29 = vpop.f32.mrb[23].mxu0 }
 0x152   : > { %v3539_v16 = vpack.c.bf16 %v2346_v2, %v2346_v2  ;;  %v2088_v18 = vld [vmem:[#allocation2 + $0x290] sm:$0xff]  ;;  %2925 = vst.msk [vmem:[%s4614_s29 + $0x3c] sm:$0xf] %vm2909_vm4, %v3477_v7  ;;  %2989 = vst.msk [vmem:[%s4614_s29 + $0x13c] sm:$0xf] %vm2909_vm4, %v3541_v8  ;;  %v2159_v23 = vadd.f32 %v4594_v35, %v2024_v17  ;;  %v1833_v28 = vadd.f32 %v3748_v22, %v497_v6  ;;  %v1574_v30 = vpop.f32.mrb[23].mxu1 }
 0x153   : > { %v2223_v24 = vadd.f32 %v4594_v35, %v2088_v18  ;;  %v2022_v25 = vld [vmem:[#allocation2 + $0x80] sm:$0xff]  ;;  %1897 = vst.msk [vmem:[#allocation2 + $0xb0] sm:$0xff] %vm281_vm3, %v1768_v9  ;;  %1961 = vst.msk [vmem:[#allocation2 + $0x2b0] sm:$0xff] %vm281_vm3, %v1832_v10  ;;  %v1767_v36 = vadd.f32 %v1318_v29, %v431_v13  ;;  %v1831_v37 = vadd.f32 %v1574_v30, %v495_v14  ;;  %v436_v48 = vld [vmem:[#allocation2 + $0xd0] sm:$0xff]  ;;  %v3687_v60 = vpop.f32.mrb[24].mxu0  ;;  %v3751_v61 = vpop.f32.mrb[24].mxu1 }
 0x154   : > { %v2086_v26 = vld [vmem:[#allocation2 + $0x280] sm:$0xff]  ;;  %2923 = vst.msk [vmem:[%s4614_s29 + $0x34] sm:$0xf] %vm2909_vm4, %v3475_v15  ;;  %2987 = vst.msk [vmem:[%s4614_s29 + $0x134] sm:$0xf] %vm2909_vm4, %v3539_v16  ;;  %v2157_v31 = vadd.f32 %v4594_v35, %v2022_v25  ;;  %v2025_v33 = vld [vmem:[#allocation2 + $0x98] sm:$0xff]  ;;  %v1772_v2 = vadd.f32 %v3687_v60, %v436_v48 }
 0x155   : > { %v2221_v32 = vadd.f32 %v4594_v35, %v2086_v26  ;;  %v2089_v34 = vld [vmem:[#allocation2 + $0x298] sm:$0xff]  ;;  %1895 = vst.msk [vmem:[#allocation2 + $0xa0] sm:$0xff] %vm281_vm3, %v1766_v19  ;;  %1959 = vst.msk [vmem:[#allocation2 + $0x2a0] sm:$0xff] %vm281_vm3, %v1830_v20  ;;  %v2287_v38 = vmax.f32 %v2159_v23, 0.0  ;;  %v2351_v39 = vmax.f32 %v2223_v24, 0.0  ;;  %v2160_v40 = vadd.f32 %v4594_v35, %v2025_v33  ;;  %v2023_v42 = vld [vmem:[#allocation2 + $0x88] sm:$0xff] }
 0x156   : > { %v2224_v41 = vadd.f32 %v4594_v35, %v2089_v34  ;;  %v2087_v43 = vld [vmem:[#allocation2 + $0x288] sm:$0xff]  ;;  %1898 = vst.msk [vmem:[#allocation2 + $0xb8] sm:$0xff] %vm281_vm3, %v1769_v27  ;;  %1962 = vst.msk [vmem:[#allocation2 + $0x2b8] sm:$0xff] %vm281_vm3, %v1833_v28  ;;  %v2285_v44 = vmax.f32 %v2157_v31, 0.0  ;;  %v2158_v46 = vadd.f32 %v4594_v35, %v2023_v42  ;;  %v500_v49 = vld [vmem:[#allocation2 + $0x2d0] sm:$0xff]  ;;  %v1331_v4 = vpop.f32.mrb[25].mxu0 }
 0x157   : > { %v2349_v45 = vmax.f32 %v2221_v32, 0.0  ;;  %v2222_v47 = vadd.f32 %v4594_v35, %v2087_v43  ;;  %1896 = vst.msk [vmem:[#allocation2 + $0xa8] sm:$0xff] %vm281_vm3, %v1767_v36  ;;  %1960 = vst.msk [vmem:[#allocation2 + $0x2a8] sm:$0xff] %vm281_vm3, %v1831_v37  ;;  %v3480_v50 = vpack.c.bf16 %v2287_v38, %v2287_v38  ;;  %v3544_v51 = vpack.c.bf16 %v2351_v39, %v2351_v39  ;;  %v434_v54 = vld [vmem:[#allocation2 + $0xc0] sm:$0xff]  ;;  %v437_v62 = vld [vmem:[#allocation2 + $0xd8] sm:$0xff]  ;;  %v1587_v5 = vpop.f32.mrb[25].mxu1 }
 0x158   : > { %v2288_v52 = vmax.f32 %v2160_v40, 0.0  ;;  %v2352_v53 = vmax.f32 %v2224_v41, 0.0  ;;  %v498_v55 = vld [vmem:[#allocation2 + $0x2c0] sm:$0xff]  ;;  %v3478_v56 = vpack.c.bf16 %v2285_v44, %v2285_v44  ;;  %v2286_v58 = vmax.f32 %v2158_v46, 0.0  ;;  %v501_v63 = vld [vmem:[#allocation2 + $0x2d8] sm:$0xff]  ;;  %v435_v6 = vld [vmem:[#allocation2 + $0xc8] sm:$0xff] }
 0x159   : > { %v3542_v57 = vpack.c.bf16 %v2349_v45, %v2349_v45  ;;  %v2350_v59 = vmax.f32 %v2222_v47, 0.0  ;;  %2928 = vst.msk [vmem:[%s4614_s29 + $0x48] sm:$0xf] %vm2909_vm4, %v3480_v50  ;;  %2992 = vst.msk [vmem:[%s4614_s29 + $0x148] sm:$0xf] %vm2909_vm4, %v3544_v51  ;;  %v1836_v3 = vadd.f32 %v3751_v61, %v500_v49  ;;  %v499_v7 = vld [vmem:[#allocation2 + $0x2c8] sm:$0xff]  ;;  %v1770_v12 = vadd.f32 %v1331_v4, %v434_v54 }
 0x15a   : > { %v3481_v0 = vpack.c.bf16 %v2288_v52, %v2288_v52  ;;  %v3545_v1 = vpack.c.bf16 %v2352_v53, %v2352_v53  ;;  %2926 = vst.msk [vmem:[%s4614_s29 + $0x40] sm:$0xf] %vm2909_vm4, %v3478_v56  ;;  %v3479_v8 = vpack.c.bf16 %v2286_v58, %v2286_v58  ;;  %v2028_v10 = vld [vmem:[#allocation2 + $0xb0] sm:$0xff]  ;;  %v1834_v13 = vadd.f32 %v1587_v5, %v498_v55  ;;  %v3688_v14 = vpop.f32.mrb[26].mxu0  ;;  %v3752_v15 = vpop.f32.mrb[26].mxu1  ;;  %v438_v47 = vld [vmem:[#allocation2 + $0xe0] sm:$0xff] }
 0x15b   : > { %2990 = vst.msk [vmem:[%s4614_s29 + $0x140] sm:$0xf] %vm2909_vm4, %v3542_v57  ;;  %v3543_v9 = vpack.c.bf16 %v2350_v59, %v2350_v59  ;;  %v2092_v11 = vld [vmem:[#allocation2 + $0x2b0] sm:$0xff]  ;;  %v2163_v16 = vadd.f32 %v4594_v35, %v2028_v10  ;;  %v1773_v20 = vadd.f32 %v3688_v14, %v437_v62  ;;  %v1837_v21 = vadd.f32 %v3752_v15, %v501_v63  ;;  %v1334_v22 = vpop.f32.mrb[27].mxu0  ;;  %v1590_v23 = vpop.f32.mrb[27].mxu1  ;;  %v502_v48 = vld [vmem:[#allocation2 + $0x2e0] sm:$0xff] }
 0x15c   : > { %2929 = vst.msk [vmem:[%s4614_s29 + $0x4c] sm:$0xf] %vm2909_vm4, %v3481_v0  ;;  %2993 = vst.msk [vmem:[%s4614_s29 + $0x14c] sm:$0xf] %vm2909_vm4, %v3545_v1  ;;  %v2227_v17 = vadd.f32 %v4594_v35, %v2092_v11  ;;  %v2026_v18 = vld [vmem:[#allocation2 + $0xa0] sm:$0xff]  ;;  %v1771_v28 = vadd.f32 %v1334_v22, %v435_v6  ;;  %v1835_v29 = vadd.f32 %v1590_v23, %v499_v7  ;;  %v440_v41 = vld [vmem:[#allocation2 + $0xf0] sm:$0xff] }
 0x15d   : > { %v2090_v19 = vld [vmem:[#allocation2 + $0x2a0] sm:$0xff]  ;;  %1901 = vst.msk [vmem:[#allocation2 + $0xd0] sm:$0xff] %vm281_vm3, %v1772_v2  ;;  %1965 = vst.msk [vmem:[#allocation2 + $0x2d0] sm:$0xff] %vm281_vm3, %v1836_v3  ;;  %v2161_v24 = vadd.f32 %v4594_v35, %v2026_v18  ;;  %v2029_v26 = vld [vmem:[#allocation2 + $0xb8] sm:$0xff]  ;;  %v2291_v30 = vmax.f32 %v2163_v16, 0.0  ;;  %v3691_v53 = vpop.f32.mrb[28].mxu0 }
 0x15e   : > { %2927 = vst.msk [vmem:[%s4614_s29 + $0x44] sm:$0xf] %vm2909_vm4, %v3479_v8  ;;  %2991 = vst.msk [vmem:[%s4614_s29 + $0x144] sm:$0xf] %vm2909_vm4, %v3543_v9  ;;  %v2225_v25 = vadd.f32 %v4594_v35, %v2090_v19  ;;  %v2093_v27 = vld [vmem:[#allocation2 + $0x2b8] sm:$0xff]  ;;  %v2355_v31 = vmax.f32 %v2227_v17, 0.0  ;;  %v2164_v32 = vadd.f32 %v4594_v35, %v2029_v26  ;;  %v1776_v59 = vadd.f32 %v3691_v53, %v440_v41 }
 0x15f   : > { %1899 = vst.msk [vmem:[#allocation2 + $0xc0] sm:$0xff] %vm281_vm3, %v1770_v12  ;;  %1963 = vst.msk [vmem:[#allocation2 + $0x2c0] sm:$0xff] %vm281_vm3, %v1834_v13  ;;  %v2228_v33 = vadd.f32 %v4594_v35, %v2093_v27  ;;  %v2027_v34 = vld [vmem:[#allocation2 + $0xa8] sm:$0xff]  ;;  %v2289_v37 = vmax.f32 %v2161_v24, 0.0  ;;  %v504_v42 = vld [vmem:[#allocation2 + $0x2f0] sm:$0xff]  ;;  %v3484_v43 = vpack.c.bf16 %v2291_v30, %v2291_v30  ;;  %v3755_v54 = vpop.f32.mrb[28].mxu1 }
 0x160   : > { %v2091_v36 = vld [vmem:[#allocation2 + $0x2a8] sm:$0xff]  ;;  %1902 = vst.msk [vmem:[#allocation2 + $0xd8] sm:$0xff] %vm281_vm3, %v1773_v20  ;;  %1966 = vst.msk [vmem:[#allocation2 + $0x2d8] sm:$0xff] %vm281_vm3, %v1837_v21  ;;  %v2353_v38 = vmax.f32 %v2225_v25, 0.0  ;;  %v2162_v39 = vadd.f32 %v4594_v35, %v2027_v34  ;;  %v3548_v44 = vpack.c.bf16 %v2355_v31, %v2355_v31  ;;  %v2292_v45 = vmax.f32 %v2164_v32, 0.0  ;;  %v441_v55 = vld [vmem:[#allocation2 + $0xf8] sm:$0xff] }
 0x161   : > { %v2226_v40 = vadd.f32 %v4594_v35, %v2091_v36  ;;  %1900 = vst.msk [vmem:[#allocation2 + $0xc8] sm:$0xff] %vm281_vm3, %v1771_v28  ;;  %1964 = vst.msk [vmem:[#allocation2 + $0x2c8] sm:$0xff] %vm281_vm3, %v1835_v29  ;;  %v2356_v46 = vmax.f32 %v2228_v33, 0.0  ;;  %v3482_v49 = vpack.c.bf16 %v2289_v37, %v2289_v37  ;;  %v505_v56 = vld [vmem:[#allocation2 + $0x2f8] sm:$0xff]  ;;  %v1840_v60 = vadd.f32 %v3755_v54, %v504_v42  ;;  %v1347_v61 = vpop.f32.mrb[29].mxu0  ;;  %v1603_v62 = vpop.f32.mrb[29].mxu1 }
 0x162   : > { %v3546_v50 = vpack.c.bf16 %v2353_v38, %v2353_v38  ;;  %v2290_v51 = vmax.f32 %v2162_v39, 0.0  ;;  %2932 = vst.msk [vmem:[%s4614_s29 + $0x58] sm:$0xf] %vm2909_vm4, %v3484_v43  ;;  %2996 = vst.msk [vmem:[%s4614_s29 + $0x158] sm:$0xf] %vm2909_vm4, %v3548_v44  ;;  %v3485_v57 = vpack.c.bf16 %v2292_v45, %v2292_v45  ;;  %v439_v63 = vld [vmem:[#allocation2 + $0xe8] sm:$0xff]  ;;  %v1774_v5 = vadd.f32 %v1347_v61, %v438_v47 }
 0x163   : > { %v2354_v52 = vmax.f32 %v2226_v40, 0.0  ;;  %v3549_v58 = vpack.c.bf16 %v2356_v46, %v2356_v46  ;;  %v503_v0 = vld [vmem:[#allocation2 + $0x2e8] sm:$0xff]  ;;  %2930 = vst.msk [vmem:[%s4614_s29 + $0x50] sm:$0xf] %vm2909_vm4, %v3482_v49  ;;  %v1838_v6 = vadd.f32 %v1603_v62, %v502_v48  ;;  %v3692_v7 = vpop.f32.mrb[30].mxu0  ;;  %v3756_v8 = vpop.f32.mrb[30].mxu1 }
 0x164   : > { %2994 = vst.msk [vmem:[%s4614_s29 + $0x150] sm:$0xf] %vm2909_vm4, %v3546_v50  ;;  %v3483_v1 = vpack.c.bf16 %v2290_v51, %v2290_v51  ;;  %v2032_v3 = vld [vmem:[#allocation2 + $0xd0] sm:$0xff]  ;;  %2933 = vst.msk [vmem:[%s4614_s29 + $0x5c] sm:$0xf] %vm2909_vm4, %v3485_v57  ;;  %v1777_v13 = vadd.f32 %v3692_v7, %v441_v55  ;;  %v1841_v14 = vadd.f32 %v3756_v8, %v505_v56  ;;  %v1350_v15 = vpop.f32.mrb[31].mxu0 }
 0x165   : > { %v3547_v2 = vpack.c.bf16 %v2354_v52, %v2354_v52  ;;  %v2096_v4 = vld [vmem:[#allocation2 + $0x2d0] sm:$0xff]  ;;  %2997 = vst.msk [vmem:[%s4614_s29 + $0x15c] sm:$0xf] %vm2909_vm4, %v3549_v58  ;;  %v2167_v9 = vadd.f32 %v4594_v35, %v2032_v3  ;;  %v1606_v16 = vpop.f32.mrb[31].mxu1  ;;  %v1775_v21 = vadd.f32 %v1350_v15, %v439_v63  ;;  %v442_v40 = vld [vmem:[#allocation2 + $0x100] sm:$0xff]  ;;  %v445_v47 = vld [vmem:[#allocation2 + $0x118] sm:$0xff] }
 0x166   : > { %v2231_v10 = vadd.f32 %v4594_v35, %v2096_v4  ;;  %v2030_v11 = vld [vmem:[#allocation2 + $0xc0] sm:$0xff]  ;;  %1905 = vst.msk [vmem:[#allocation2 + $0xf0] sm:$0xff] %vm281_vm3, %v1776_v59  ;;  %1969 = vst.msk [vmem:[#allocation2 + $0x2f0] sm:$0xff] %vm281_vm3, %v1840_v60  ;;  %v1839_v22 = vadd.f32 %v1606_v16, %v503_v0  ;;  %v444_v33 = vld [vmem:[#allocation2 + $0x110] sm:$0xff]  ;;  %v3759_v46 = vpop.f32.mrb[32].mxu1 }
 0x167   : > { %v2094_v12 = vld [vmem:[#allocation2 + $0x2c0] sm:$0xff]  ;;  %2931 = vst.msk [vmem:[%s4614_s29 + $0x54] sm:$0xf] %vm2909_vm4, %v3483_v1  ;;  %2995 = vst.msk [vmem:[%s4614_s29 + $0x154] sm:$0xf] %vm2909_vm4, %v3547_v2  ;;  %v2165_v17 = vadd.f32 %v4594_v35, %v2030_v11  ;;  %v2033_v19 = vld [vmem:[#allocation2 + $0xd8] sm:$0xff] }
 0x168   : > { %v2229_v18 = vadd.f32 %v4594_v35, %v2094_v12  ;;  %v2097_v20 = vld [vmem:[#allocation2 + $0x2d8] sm:$0xff]  ;;  %1903 = vst.msk [vmem:[#allocation2 + $0xe0] sm:$0xff] %vm281_vm3, %v1774_v5  ;;  %1967 = vst.msk [vmem:[#allocation2 + $0x2e0] sm:$0xff] %vm281_vm3, %v1838_v6  ;;  %v2295_v23 = vmax.f32 %v2167_v9, 0.0  ;;  %v2359_v24 = vmax.f32 %v2231_v10, 0.0  ;;  %v2168_v25 = vadd.f32 %v4594_v35, %v2033_v19  ;;  %v2031_v27 = vld [vmem:[#allocation2 + $0xc8] sm:$0xff] }
 0x169   : > { %v2232_v26 = vadd.f32 %v4594_v35, %v2097_v20  ;;  %v2095_v28 = vld [vmem:[#allocation2 + $0x2c8] sm:$0xff]  ;;  %1906 = vst.msk [vmem:[#allocation2 + $0xf8] sm:$0xff] %vm281_vm3, %v1777_v13  ;;  %1970 = vst.msk [vmem:[#allocation2 + $0x2f8] sm:$0xff] %vm281_vm3, %v1841_v14  ;;  %v2293_v29 = vmax.f32 %v2165_v17, 0.0  ;;  %v2166_v31 = vadd.f32 %v4594_v35, %v2031_v27  ;;  %v508_v34 = vld [vmem:[#allocation2 + $0x310] sm:$0xff]  ;;  %v1619_v54 = vpop.f32.mrb[33].mxu1 }
 0x16a   : > { %v2357_v30 = vmax.f32 %v2229_v18, 0.0  ;;  %v2230_v32 = vadd.f32 %v4594_v35, %v2095_v28  ;;  %1904 = vst.msk [vmem:[#allocation2 + $0xe8] sm:$0xff] %vm281_vm3, %v1775_v21  ;;  %1968 = vst.msk [vmem:[#allocation2 + $0x2e8] sm:$0xff] %vm281_vm3, %v1839_v22  ;;  %v3488_v36 = vpack.c.bf16 %v2295_v23, %v2295_v23  ;;  %v3552_v37 = vpack.c.bf16 %v2359_v24, %v2359_v24  ;;  %v506_v41 = vld [vmem:[#allocation2 + $0x300] sm:$0xff]  ;;  %v3695_v35 = vpop.f32.mrb[32].mxu0  ;;  %v509_v48 = vld [vmem:[#allocation2 + $0x318] sm:$0xff] }
 0x16b   : > { %v2296_v38 = vmax.f32 %v2168_v25, 0.0  ;;  %v2360_v39 = vmax.f32 %v2232_v26, 0.0  ;;  %v3486_v42 = vpack.c.bf16 %v2293_v29, %v2293_v29  ;;  %v2294_v44 = vmax.f32 %v2166_v31, 0.0  ;;  %v1363_v53 = vpop.f32.mrb[33].mxu0  ;;  %v443_v55 = vld [vmem:[#allocation2 + $0x108] sm:$0xff]  ;;  %v3760_v0 = vpop.f32.mrb[34].mxu1 }
 0x16c   : > { %v3550_v43 = vpack.c.bf16 %v2357_v30, %v2357_v30  ;;  %v2358_v45 = vmax.f32 %v2230_v32, 0.0  ;;  %2936 = vst.msk [vmem:[%s4614_s29 + $0x68] sm:$0xf] %vm2909_vm4, %v3488_v36  ;;  %3000 = vst.msk [vmem:[%s4614_s29 + $0x168] sm:$0xf] %vm2909_vm4, %v3552_v37  ;;  %v1780_v51 = vadd.f32 %v3695_v35, %v444_v33  ;;  %v1844_v52 = vadd.f32 %v3759_v46, %v508_v34  ;;  %v507_v56 = vld [vmem:[#allocation2 + $0x308] sm:$0xff] }
 0x16d   : > { %v3489_v49 = vpack.c.bf16 %v2296_v38, %v2296_v38  ;;  %v3553_v50 = vpack.c.bf16 %v2360_v39, %v2360_v39  ;;  %2934 = vst.msk [vmem:[%s4614_s29 + $0x60] sm:$0xf] %vm2909_vm4, %v3486_v42  ;;  %v3487_v57 = vpack.c.bf16 %v2294_v44, %v2294_v44  ;;  %v2036_v59 = vld [vmem:[#allocation2 + $0xf0] sm:$0xff]  ;;  %v1778_v61 = vadd.f32 %v1363_v53, %v442_v40  ;;  %v3696_v63 = vpop.f32.mrb[34].mxu0  ;;  %v4823_v1 = vld [vmem:[%s5167_s2] ss:$0 sm:$0xff] }
 0x16e   : > { %2998 = vst.msk [vmem:[%s4614_s29 + $0x160] sm:$0xf] %vm2909_vm4, %v3550_v43  ;;  %v3551_v58 = vpack.c.bf16 %v2358_v45, %v2358_v45  ;;  %v2100_v60 = vld [vmem:[#allocation2 + $0x2f0] sm:$0xff]  ;;  %v1842_v62 = vadd.f32 %v1619_v54, %v506_v41  ;;  %v2171_v2 = vadd.f32 %v4823_v1, %v2036_v59  ;;  %v1781_v6 = vadd.f32 %v3696_v63, %v445_v47  ;;  %v1366_v8 = vpop.f32.mrb[35].mxu0  ;;  %v1622_v9 = vpop.f32.mrb[35].mxu1  ;;  %v446_v32 = vld [vmem:[#allocation2 + $0x120] sm:$0xff] }
 0x16f   : > { %2937 = vst.msk [vmem:[%s4614_s29 + $0x6c] sm:$0xf] %vm2909_vm4, %v3489_v49  ;;  %3001 = vst.msk [vmem:[%s4614_s29 + $0x16c] sm:$0xf] %vm2909_vm4, %v3553_v50  ;;  %v2235_v3 = vadd.f32 %v4823_v1, %v2100_v60  ;;  %v2034_v4 = vld [vmem:[#allocation2 + $0xe0] sm:$0xff]  ;;  %v1845_v7 = vadd.f32 %v3760_v0, %v509_v48  ;;  %v1779_v14 = vadd.f32 %v1366_v8, %v443_v55  ;;  %v448_v26 = vld [vmem:[#allocation2 + $0x130] sm:$0xff] }
 0x170   : > { %v2098_v5 = vld [vmem:[#allocation2 + $0x2e0] sm:$0xff]  ;;  %1909 = vst.msk [vmem:[#allocation2 + $0x110] sm:$0xff] %vm281_vm3, %v1780_v51  ;;  %1973 = vst.msk [vmem:[#allocation2 + $0x310] sm:$0xff] %vm281_vm3, %v1844_v52  ;;  %v2169_v10 = vadd.f32 %v4823_v1, %v2034_v4  ;;  %v2037_v12 = vld [vmem:[#allocation2 + $0xf8] sm:$0xff]  ;;  %v1843_v15 = vadd.f32 %v1622_v9, %v507_v56  ;;  %v2299_v16 = vmax.f32 %v2171_v2, 0.0  ;;  %v3699_v39 = vpop.f32.mrb[36].mxu0 }
 0x171   : > { %2935 = vst.msk [vmem:[%s4614_s29 + $0x64] sm:$0xf] %vm2909_vm4, %v3487_v57  ;;  %2999 = vst.msk [vmem:[%s4614_s29 + $0x164] sm:$0xf] %vm2909_vm4, %v3551_v58  ;;  %v2233_v11 = vadd.f32 %v4823_v1, %v2098_v5  ;;  %v2101_v13 = vld [vmem:[#allocation2 + $0x2f8] sm:$0xff]  ;;  %v2363_v17 = vmax.f32 %v2235_v3, 0.0  ;;  %v2172_v18 = vadd.f32 %v4823_v1, %v2037_v12  ;;  %v1784_v45 = vadd.f32 %v3699_v39, %v448_v26 }
 0x172   : > { %1907 = vst.msk [vmem:[#allocation2 + $0x100] sm:$0xff] %vm281_vm3, %v1778_v61  ;;  %1971 = vst.msk [vmem:[#allocation2 + $0x300] sm:$0xff] %vm281_vm3, %v1842_v62  ;;  %v2236_v19 = vadd.f32 %v4823_v1, %v2101_v13  ;;  %v2035_v20 = vld [vmem:[#allocation2 + $0xe8] sm:$0xff]  ;;  %v2297_v22 = vmax.f32 %v2169_v10, 0.0  ;;  %v512_v27 = vld [vmem:[#allocation2 + $0x330] sm:$0xff]  ;;  %v3492_v28 = vpack.c.bf16 %v2299_v16, %v2299_v16  ;;  %v3763_v40 = vpop.f32.mrb[36].mxu1 }
 0x173   : > { %v2099_v21 = vld [vmem:[#allocation2 + $0x2e8] sm:$0xff]  ;;  %1910 = vst.msk [vmem:[#allocation2 + $0x118] sm:$0xff] %vm281_vm3, %v1781_v6  ;;  %1974 = vst.msk [vmem:[#allocation2 + $0x318] sm:$0xff] %vm281_vm3, %v1845_v7  ;;  %v2361_v23 = vmax.f32 %v2233_v11, 0.0  ;;  %v2170_v24 = vadd.f32 %v4823_v1, %v2035_v20  ;;  %v3556_v29 = vpack.c.bf16 %v2363_v17, %v2363_v17  ;;  %v2300_v30 = vmax.f32 %v2172_v18, 0.0  ;;  %v510_v33 = vld [vmem:[#allocation2 + $0x320] sm:$0xff] }
 0x174   : > { %v2234_v25 = vadd.f32 %v4823_v1, %v2099_v21  ;;  %1908 = vst.msk [vmem:[#allocation2 + $0x108] sm:$0xff] %vm281_vm3, %v1779_v14  ;;  %1972 = vst.msk [vmem:[#allocation2 + $0x308] sm:$0xff] %vm281_vm3, %v1843_v15  ;;  %v2364_v31 = vmax.f32 %v2236_v19, 0.0  ;;  %v3490_v34 = vpack.c.bf16 %v2297_v22, %v2297_v22  ;;  %v449_v41 = vld [vmem:[#allocation2 + $0x138] sm:$0xff]  ;;  %v1848_v35 = vadd.f32 %v3763_v40, %v512_v27  ;;  %v1379_v46 = vpop.f32.mrb[37].mxu0  ;;  %v1635_v47 = vpop.f32.mrb[37].mxu1 }
 0x175   : > { %v3554_v36 = vpack.c.bf16 %v2361_v23, %v2361_v23  ;;  %v2298_v37 = vmax.f32 %v2170_v24, 0.0  ;;  %v513_v42 = vld [vmem:[#allocation2 + $0x338] sm:$0xff]  ;;  %2940 = vst.msk [vmem:[%s4614_s29 + $0x78] sm:$0xf] %vm2909_vm4, %v3492_v28  ;;  %3004 = vst.msk [vmem:[%s4614_s29 + $0x178] sm:$0xf] %vm2909_vm4, %v3556_v29  ;;  %v3493_v43 = vpack.c.bf16 %v2300_v30, %v2300_v30  ;;  %v1782_v54 = vadd.f32 %v1379_v46, %v446_v32 }
 0x176   : > { %v2362_v38 = vmax.f32 %v2234_v25, 0.0  ;;  %v3557_v44 = vpack.c.bf16 %v2364_v31, %v2364_v31  ;;  %v447_v48 = vld [vmem:[#allocation2 + $0x128] sm:$0xff]  ;;  %2938 = vst.msk [vmem:[%s4614_s29 + $0x70] sm:$0xf] %vm2909_vm4, %v3490_v34  ;;  %v1846_v55 = vadd.f32 %v1635_v47, %v510_v33  ;;  %v3700_v56 = vpop.f32.mrb[38].mxu0  ;;  %v3764_v57 = vpop.f32.mrb[38].mxu1 }
 0x177   : > { %v511_v49 = vld [vmem:[#allocation2 + $0x328] sm:$0xff]  ;;  %3002 = vst.msk [vmem:[%s4614_s29 + $0x170] sm:$0xf] %vm2909_vm4, %v3554_v36  ;;  %v3491_v50 = vpack.c.bf16 %v2298_v37, %v2298_v37  ;;  %v2040_v52 = vld [vmem:[#allocation2 + $0x110] sm:$0xff]  ;;  %2941 = vst.msk [vmem:[%s4614_s29 + $0x7c] sm:$0xf] %vm2909_vm4, %v3493_v43  ;;  %v1785_v62 = vadd.f32 %v3700_v56, %v449_v41  ;;  %v1849_v63 = vadd.f32 %v3764_v57, %v513_v42 }
 0x178   : > { %v3555_v51 = vpack.c.bf16 %v2362_v38, %v2362_v38  ;;  %v2104_v53 = vld [vmem:[#allocation2 + $0x310] sm:$0xff]  ;;  %3005 = vst.msk [vmem:[%s4614_s29 + $0x17c] sm:$0xf] %vm2909_vm4, %v3557_v44  ;;  %v2175_v58 = vadd.f32 %v4823_v1, %v2040_v52  ;;  %v1382_v0 = vpop.f32.mrb[39].mxu0  ;;  %v1638_v2 = vpop.f32.mrb[39].mxu1  ;;  %v450_v25 = vld [vmem:[#allocation2 + $0x140] sm:$0xff] }
 0x179   : > { %v2239_v59 = vadd.f32 %v4823_v1, %v2104_v53  ;;  %v2038_v60 = vld [vmem:[#allocation2 + $0x100] sm:$0xff]  ;;  %1913 = vst.msk [vmem:[#allocation2 + $0x130] sm:$0xff] %vm281_vm3, %v1784_v45  ;;  %1977 = vst.msk [vmem:[#allocation2 + $0x330] sm:$0xff] %vm281_vm3, %v1848_v35  ;;  %v1783_v7 = vadd.f32 %v1382_v0, %v447_v48  ;;  %v1847_v8 = vadd.f32 %v1638_v2, %v511_v49  ;;  %v452_v19 = vld [vmem:[#allocation2 + $0x150] sm:$0xff]  ;;  %v3703_v31 = vpop.f32.mrb[40].mxu0  ;;  %v3767_v32 = vpop.f32.mrb[40].mxu1 }
 0x17a   : > { %v2102_v61 = vld [vmem:[#allocation2 + $0x300] sm:$0xff]  ;;  %2939 = vst.msk [vmem:[%s4614_s29 + $0x74] sm:$0xf] %vm2909_vm4, %v3491_v50  ;;  %3003 = vst.msk [vmem:[%s4614_s29 + $0x174] sm:$0xf] %vm2909_vm4, %v3555_v51  ;;  %v2173_v3 = vadd.f32 %v4823_v1, %v2038_v60  ;;  %v2041_v5 = vld [vmem:[#allocation2 + $0x118] sm:$0xff]  ;;  %v1788_v38 = vadd.f32 %v3703_v31, %v452_v19 }
 0x17b   : > { %v2237_v4 = vadd.f32 %v4823_v1, %v2102_v61  ;;  %v2105_v6 = vld [vmem:[#allocation2 + $0x318] sm:$0xff]  ;;  %1911 = vst.msk [vmem:[#allocation2 + $0x120] sm:$0xff] %vm281_vm3, %v1782_v54  ;;  %1975 = vst.msk [vmem:[#allocation2 + $0x320] sm:$0xff] %vm281_vm3, %v1846_v55  ;;  %v2303_v9 = vmax.f32 %v2175_v58, 0.0  ;;  %v2367_v10 = vmax.f32 %v2239_v59, 0.0  ;;  %v2176_v11 = vadd.f32 %v4823_v1, %v2041_v5  ;;  %v2039_v13 = vld [vmem:[#allocation2 + $0x108] sm:$0xff] }
 0x17c   : > { %v2240_v12 = vadd.f32 %v4823_v1, %v2105_v6  ;;  %v2103_v14 = vld [vmem:[#allocation2 + $0x308] sm:$0xff]  ;;  %1914 = vst.msk [vmem:[#allocation2 + $0x138] sm:$0xff] %vm281_vm3, %v1785_v62  ;;  %1978 = vst.msk [vmem:[#allocation2 + $0x338] sm:$0xff] %vm281_vm3, %v1849_v63  ;;  %v2301_v15 = vmax.f32 %v2173_v3, 0.0  ;;  %v2174_v17 = vadd.f32 %v4823_v1, %v2039_v13  ;;  %v516_v20 = vld [vmem:[#allocation2 + $0x350] sm:$0xff]  ;;  %v1395_v40 = vpop.f32.mrb[41].mxu0 }
 0x17d   : > { %v2365_v16 = vmax.f32 %v2237_v4, 0.0  ;;  %v2238_v18 = vadd.f32 %v4823_v1, %v2103_v14  ;;  %1912 = vst.msk [vmem:[#allocation2 + $0x128] sm:$0xff] %vm281_vm3, %v1783_v7  ;;  %1976 = vst.msk [vmem:[#allocation2 + $0x328] sm:$0xff] %vm281_vm3, %v1847_v8  ;;  %v3496_v21 = vpack.c.bf16 %v2303_v9, %v2303_v9  ;;  %v3560_v22 = vpack.c.bf16 %v2367_v10, %v2367_v10  ;;  %v514_v26 = vld [vmem:[#allocation2 + $0x340] sm:$0xff]  ;;  %v453_v33 = vld [vmem:[#allocation2 + $0x158] sm:$0xff]  ;;  %v1651_v41 = vpop.f32.mrb[41].mxu1 }
 0x17e   : > { %v2304_v23 = vmax.f32 %v2176_v11, 0.0  ;;  %v2368_v24 = vmax.f32 %v2240_v12, 0.0  ;;  %v3494_v27 = vpack.c.bf16 %v2301_v15, %v2301_v15  ;;  %v2302_v29 = vmax.f32 %v2174_v17, 0.0  ;;  %v517_v34 = vld [vmem:[#allocation2 + $0x358] sm:$0xff]  ;;  %v451_v42 = vld [vmem:[#allocation2 + $0x148] sm:$0xff]  ;;  %v3704_v49 = vpop.f32.mrb[42].mxu0 }
 0x17f   : > { %v3558_v28 = vpack.c.bf16 %v2365_v16, %v2365_v16  ;;  %v2366_v30 = vmax.f32 %v2238_v18, 0.0  ;;  %2944 = vst.msk [vmem:[%s4614_s29 + $0x88] sm:$0xf] %vm2909_vm4, %v3496_v21  ;;  %3008 = vst.msk [vmem:[%s4614_s29 + $0x188] sm:$0xf] %vm2909_vm4, %v3560_v22  ;;  %v1852_v39 = vadd.f32 %v3767_v32, %v516_v20  ;;  %v515_v43 = vld [vmem:[#allocation2 + $0x348] sm:$0xff]  ;;  %v1786_v47 = vadd.f32 %v1395_v40, %v450_v25 }
 0x180   : > { %v3497_v36 = vpack.c.bf16 %v2304_v23, %v2304_v23  ;;  %v3561_v37 = vpack.c.bf16 %v2368_v24, %v2368_v24  ;;  %2942 = vst.msk [vmem:[%s4614_s29 + $0x80] sm:$0xf] %vm2909_vm4, %v3494_v27  ;;  %v3495_v44 = vpack.c.bf16 %v2302_v29, %v2302_v29  ;;  %v2044_v35 = vld [vmem:[#allocation2 + $0x130] sm:$0xff]  ;;  %v1850_v48 = vadd.f32 %v1651_v41, %v514_v26  ;;  %v3768_v50 = vpop.f32.mrb[42].mxu1  ;;  %v1398_v57 = vpop.f32.mrb[43].mxu0  ;;  %v454_v18 = vld [vmem:[#allocation2 + $0x160] sm:$0xff] }
 0x181   : > { %3006 = vst.msk [vmem:[%s4614_s29 + $0x180] sm:$0xf] %vm2909_vm4, %v3558_v28  ;;  %v3559_v45 = vpack.c.bf16 %v2366_v30, %v2366_v30  ;;  %v2108_v46 = vld [vmem:[#allocation2 + $0x330] sm:$0xff]  ;;  %v2179_v51 = vadd.f32 %v4823_v1, %v2044_v35  ;;  %v1789_v55 = vadd.f32 %v3704_v49, %v453_v33  ;;  %v1853_v56 = vadd.f32 %v3768_v50, %v517_v34  ;;  %v1654_v58 = vpop.f32.mrb[43].mxu1  ;;  %v518_v19 = vld [vmem:[#allocation2 + $0x360] sm:$0xff]  ;;  %v3707_v24 = vpop.f32.mrb[44].mxu0 }
 0x182   : > { %2945 = vst.msk [vmem:[%s4614_s29 + $0x8c] sm:$0xf] %vm2909_vm4, %v3497_v36  ;;  %3009 = vst.msk [vmem:[%s4614_s29 + $0x18c] sm:$0xf] %vm2909_vm4, %v3561_v37  ;;  %v2243_v52 = vadd.f32 %v4823_v1, %v2108_v46  ;;  %v2042_v53 = vld [vmem:[#allocation2 + $0x120] sm:$0xff]  ;;  %v1787_v63 = vadd.f32 %v1398_v57, %v451_v42  ;;  %v1851_v0 = vadd.f32 %v1654_v58, %v515_v43  ;;  %v456_v12 = vld [vmem:[#allocation2 + $0x170] sm:$0xff] }
 0x183   : > { %v2106_v54 = vld [vmem:[#allocation2 + $0x320] sm:$0xff]  ;;  %1917 = vst.msk [vmem:[#allocation2 + $0x150] sm:$0xff] %vm281_vm3, %v1788_v38  ;;  %1981 = vst.msk [vmem:[#allocation2 + $0x350] sm:$0xff] %vm281_vm3, %v1852_v39  ;;  %v2177_v59 = vadd.f32 %v4823_v1, %v2042_v53  ;;  %v2045_v61 = vld [vmem:[#allocation2 + $0x138] sm:$0xff]  ;;  %v2307_v2 = vmax.f32 %v2179_v51, 0.0  ;;  %v3771_v25 = vpop.f32.mrb[44].mxu1  ;;  %v1792_v30 = vadd.f32 %v3707_v24, %v456_v12 }
 0x184   : > { %2943 = vst.msk [vmem:[%s4614_s29 + $0x84] sm:$0xf] %vm2909_vm4, %v3495_v44  ;;  %3007 = vst.msk [vmem:[%s4614_s29 + $0x184] sm:$0xf] %vm2909_vm4, %v3559_v45  ;;  %v2241_v60 = vadd.f32 %v4823_v1, %v2106_v54  ;;  %v2109_v62 = vld [vmem:[#allocation2 + $0x338] sm:$0xff]  ;;  %v2371_v3 = vmax.f32 %v2243_v52, 0.0  ;;  %v2180_v4 = vadd.f32 %v4823_v1, %v2045_v61 }
 0x185   : > { %1915 = vst.msk [vmem:[#allocation2 + $0x140] sm:$0xff] %vm281_vm3, %v1786_v47  ;;  %1979 = vst.msk [vmem:[#allocation2 + $0x340] sm:$0xff] %vm281_vm3, %v1850_v48  ;;  %v2244_v5 = vadd.f32 %v4823_v1, %v2109_v62  ;;  %v2043_v6 = vld [vmem:[#allocation2 + $0x128] sm:$0xff]  ;;  %v2305_v8 = vmax.f32 %v2177_v59, 0.0  ;;  %v520_v13 = vld [vmem:[#allocation2 + $0x370] sm:$0xff]  ;;  %v3500_v14 = vpack.c.bf16 %v2307_v2, %v2307_v2  ;;  %v1411_v32 = vpop.f32.mrb[45].mxu0 }
 0x186   : > { %v2107_v7 = vld [vmem:[#allocation2 + $0x328] sm:$0xff]  ;;  %1918 = vst.msk [vmem:[#allocation2 + $0x158] sm:$0xff] %vm281_vm3, %v1789_v55  ;;  %1982 = vst.msk [vmem:[#allocation2 + $0x358] sm:$0xff] %vm281_vm3, %v1853_v56  ;;  %v2369_v9 = vmax.f32 %v2241_v60, 0.0  ;;  %v2178_v10 = vadd.f32 %v4823_v1, %v2043_v6  ;;  %v3564_v15 = vpack.c.bf16 %v2371_v3, %v2371_v3  ;;  %v2308_v16 = vmax.f32 %v2180_v4, 0.0  ;;  %v457_v26 = vld [vmem:[#allocation2 + $0x178] sm:$0xff] }
 0x187   : > { %v2242_v11 = vadd.f32 %v4823_v1, %v2107_v7  ;;  %1916 = vst.msk [vmem:[#allocation2 + $0x148] sm:$0xff] %vm281_vm3, %v1787_v63  ;;  %1980 = vst.msk [vmem:[#allocation2 + $0x348] sm:$0xff] %vm281_vm3, %v1851_v0  ;;  %v2372_v17 = vmax.f32 %v2244_v5, 0.0  ;;  %v3498_v20 = vpack.c.bf16 %v2305_v8, %v2305_v8  ;;  %v521_v27 = vld [vmem:[#allocation2 + $0x378] sm:$0xff]  ;;  %v1856_v31 = vadd.f32 %v3771_v25, %v520_v13  ;;  %v1667_v33 = vpop.f32.mrb[45].mxu1  ;;  %v455_v34 = vld [vmem:[#allocation2 + $0x168] sm:$0xff] }
 0x188   : > { %v3562_v21 = vpack.c.bf16 %v2369_v9, %v2369_v9  ;;  %v2306_v22 = vmax.f32 %v2178_v10, 0.0  ;;  %2948 = vst.msk [vmem:[%s4614_s29 + $0x98] sm:$0xf] %vm2909_vm4, %v3500_v14  ;;  %3012 = vst.msk [vmem:[%s4614_s29 + $0x198] sm:$0xf] %vm2909_vm4, %v3564_v15  ;;  %v3501_v28 = vpack.c.bf16 %v2308_v16, %v2308_v16  ;;  %v519_v36 = vld [vmem:[#allocation2 + $0x368] sm:$0xff]  ;;  %v1790_v41 = vadd.f32 %v1411_v32, %v454_v18 }
 0x189   : > { %v2370_v23 = vmax.f32 %v2242_v11, 0.0  ;;  %v3565_v29 = vpack.c.bf16 %v2372_v17, %v2372_v17  ;;  %2946 = vst.msk [vmem:[%s4614_s29 + $0x90] sm:$0xf] %vm2909_vm4, %v3498_v20  ;;  %v1854_v42 = vadd.f32 %v1667_v33, %v518_v19  ;;  %v3708_v43 = vpop.f32.mrb[46].mxu0  ;;  %v3772_v44 = vpop.f32.mrb[46].mxu1  ;;  %v460_v5 = vld [vmem:[#allocation2 + $0x190] sm:$0xff] }
 0x18a   : > { %3010 = vst.msk [vmem:[%s4614_s29 + $0x190] sm:$0xf] %vm2909_vm4, %v3562_v21  ;;  %v3499_v37 = vpack.c.bf16 %v2306_v22, %v2306_v22  ;;  %v2048_v39 = vld [vmem:[#allocation2 + $0x150] sm:$0xff]  ;;  %2949 = vst.msk [vmem:[%s4614_s29 + $0x9c] sm:$0xf] %vm2909_vm4, %v3501_v28  ;;  %v1793_v48 = vadd.f32 %v3708_v43, %v457_v26  ;;  %v1857_v49 = vadd.f32 %v3772_v44, %v521_v27  ;;  %v1414_v50 = vpop.f32.mrb[47].mxu0 }
 0x18b   : > { %v3563_v38 = vpack.c.bf16 %v2370_v23, %v2370_v23  ;;  %v2112_v40 = vld [vmem:[#allocation2 + $0x350] sm:$0xff]  ;;  %3013 = vst.msk [vmem:[%s4614_s29 + $0x19c] sm:$0xf] %vm2909_vm4, %v3565_v29  ;;  %v2183_v45 = vadd.f32 %v4823_v1, %v2048_v39  ;;  %v1670_v51 = vpop.f32.mrb[47].mxu1  ;;  %v1791_v56 = vadd.f32 %v1414_v50, %v455_v34  ;;  %v458_v11 = vld [vmem:[#allocation2 + $0x180] sm:$0xff]  ;;  %v3711_v17 = vpop.f32.mrb[48].mxu0 }
 0x18c   : > { %v2247_v35 = vadd.f32 %v4823_v1, %v2112_v40  ;;  %v2046_v46 = vld [vmem:[#allocation2 + $0x140] sm:$0xff]  ;;  %1921 = vst.msk [vmem:[#allocation2 + $0x170] sm:$0xff] %vm281_vm3, %v1792_v30  ;;  %1985 = vst.msk [vmem:[#allocation2 + $0x370] sm:$0xff] %vm281_vm3, %v1856_v31  ;;  %v1855_v57 = vadd.f32 %v1670_v51, %v519_v36  ;;  %v524_v6 = vld [vmem:[#allocation2 + $0x390] sm:$0xff]  ;;  %v3775_v18 = vpop.f32.mrb[48].mxu1  ;;  %v1796_v23 = vadd.f32 %v3711_v17, %v460_v5  ;;  %v1427_v25 = vpop.f32.mrb[49].mxu0 }
 0x18d   : > { %v2110_v47 = vld [vmem:[#allocation2 + $0x340] sm:$0xff]  ;;  %2947 = vst.msk [vmem:[%s4614_s29 + $0x94] sm:$0xf] %vm2909_vm4, %v3499_v37  ;;  %3011 = vst.msk [vmem:[%s4614_s29 + $0x194] sm:$0xf] %vm2909_vm4, %v3563_v38  ;;  %v2181_v52 = vadd.f32 %v4823_v1, %v2046_v46  ;;  %v2049_v54 = vld [vmem:[#allocation2 + $0x158] sm:$0xff]  ;;  %v1860_v24 = vadd.f32 %v3775_v18, %v524_v6  ;;  %v1794_v33 = vadd.f32 %v1427_v25, %v458_v11 }
 0x18e   : > { %v2245_v53 = vadd.f32 %v4823_v1, %v2110_v47  ;;  %v2113_v55 = vld [vmem:[#allocation2 + $0x358] sm:$0xff]  ;;  %1919 = vst.msk [vmem:[#allocation2 + $0x160] sm:$0xff] %vm281_vm3, %v1790_v41  ;;  %1983 = vst.msk [vmem:[#allocation2 + $0x360] sm:$0xff] %vm281_vm3, %v1854_v42  ;;  %v2311_v58 = vmax.f32 %v2183_v45, 0.0  ;;  %v2375_v59 = vmax.f32 %v2247_v35, 0.0  ;;  %v2184_v60 = vadd.f32 %v4823_v1, %v2049_v54  ;;  %v2047_v62 = vld [vmem:[#allocation2 + $0x148] sm:$0xff] }
 0x18f   : > { %v2248_v61 = vadd.f32 %v4823_v1, %v2113_v55  ;;  %v2111_v63 = vld [vmem:[#allocation2 + $0x348] sm:$0xff]  ;;  %1922 = vst.msk [vmem:[#allocation2 + $0x178] sm:$0xff] %vm281_vm3, %v1793_v48  ;;  %1986 = vst.msk [vmem:[#allocation2 + $0x378] sm:$0xff] %vm281_vm3, %v1857_v49  ;;  %v2309_v0 = vmax.f32 %v2181_v52, 0.0  ;;  %v2182_v3 = vadd.f32 %v4823_v1, %v2047_v62  ;;  %v522_v12 = vld [vmem:[#allocation2 + $0x380] sm:$0xff]  ;;  %v1683_v26 = vpop.f32.mrb[49].mxu1 }
 0x190   : > { %v2373_v2 = vmax.f32 %v2245_v53, 0.0  ;;  %v2246_v4 = vadd.f32 %v4823_v1, %v2111_v63  ;;  %1920 = vst.msk [vmem:[#allocation2 + $0x168] sm:$0xff] %vm281_vm3, %v1791_v56  ;;  %1984 = vst.msk [vmem:[#allocation2 + $0x368] sm:$0xff] %vm281_vm3, %v1855_v57  ;;  %v3504_v7 = vpack.c.bf16 %v2311_v58, %v2311_v58  ;;  %v3568_v8 = vpack.c.bf16 %v2375_v59, %v2375_v59  ;;  %v461_v19 = vld [vmem:[#allocation2 + $0x198] sm:$0xff]  ;;  %v459_v27 = vld [vmem:[#allocation2 + $0x188] sm:$0xff]  ;;  %v3712_v36 = vpop.f32.mrb[50].mxu0 }
 0x191   : > { %v2312_v9 = vmax.f32 %v2184_v60, 0.0  ;;  %v2376_v10 = vmax.f32 %v2248_v61, 0.0  ;;  %v3502_v13 = vpack.c.bf16 %v2309_v0, %v2309_v0  ;;  %v2310_v15 = vmax.f32 %v2182_v3, 0.0  ;;  %v525_v20 = vld [vmem:[#allocation2 + $0x398] sm:$0xff]  ;;  %v523_v28 = vld [vmem:[#allocation2 + $0x388] sm:$0xff]  ;;  %v3776_v37 = vpop.f32.mrb[50].mxu1 }
 0x192   : > { %v3566_v14 = vpack.c.bf16 %v2373_v2, %v2373_v2  ;;  %v2374_v16 = vmax.f32 %v2246_v4, 0.0  ;;  %2952 = vst.msk [vmem:[%s4614_s29 + $0xa8] sm:$0xf] %vm2909_vm4, %v3504_v7  ;;  %3016 = vst.msk [vmem:[%s4614_s29 + $0x1a8] sm:$0xf] %vm2909_vm4, %v3568_v8  ;;  %v1858_v34 = vadd.f32 %v1683_v26, %v522_v12  ;;  %v1797_v42 = vadd.f32 %v3712_v36, %v461_v19  ;;  %v1430_v44 = vpop.f32.mrb[51].mxu0 }
 0x193   : > { %v3505_v21 = vpack.c.bf16 %v2312_v9, %v2312_v9  ;;  %v3569_v22 = vpack.c.bf16 %v2376_v10, %v2376_v10  ;;  %2950 = vst.msk [vmem:[%s4614_s29 + $0xa0] sm:$0xf] %vm2909_vm4, %v3502_v13  ;;  %v3503_v29 = vpack.c.bf16 %v2310_v15, %v2310_v15  ;;  %v2052_v31 = vld [vmem:[#allocation2 + $0x170] sm:$0xff]  ;;  %v1861_v43 = vadd.f32 %v3776_v37, %v525_v20  ;;  %v1686_v45 = vpop.f32.mrb[51].mxu1  ;;  %v462_v4 = vld [vmem:[#allocation2 + $0x1a0] sm:$0xff]  ;;  %v3715_v10 = vpop.f32.mrb[52].mxu0 }
 0x194   : > { %3014 = vst.msk [vmem:[%s4614_s29 + $0x1a0] sm:$0xf] %vm2909_vm4, %v3566_v14  ;;  %v3567_v30 = vpack.c.bf16 %v2374_v16, %v2374_v16  ;;  %v2116_v32 = vld [vmem:[#allocation2 + $0x370] sm:$0xff]  ;;  %v2187_v38 = vadd.f32 %v4823_v1, %v2052_v31  ;;  %v1795_v49 = vadd.f32 %v1430_v44, %v459_v27  ;;  %v1859_v50 = vadd.f32 %v1686_v45, %v523_v28  ;;  %v526_v5 = vld [vmem:[#allocation2 + $0x3a0] sm:$0xff]  ;;  %v3779_v11 = vpop.f32.mrb[52].mxu1  ;;  %v465_v12 = vld [vmem:[#allocation2 + $0x1b8] sm:$0xff] }
 0x195   : > { %2953 = vst.msk [vmem:[%s4614_s29 + $0xac] sm:$0xf] %vm2909_vm4, %v3505_v21  ;;  %3017 = vst.msk [vmem:[%s4614_s29 + $0x1ac] sm:$0xf] %vm2909_vm4, %v3569_v22  ;;  %v2251_v39 = vadd.f32 %v4823_v1, %v2116_v32  ;;  %v2050_v40 = vld [vmem:[#allocation2 + $0x160] sm:$0xff]  ;;  %v464_v61 = vld [vmem:[#allocation2 + $0x1b0] sm:$0xff] }
 0x196   : > { %v2114_v41 = vld [vmem:[#allocation2 + $0x360] sm:$0xff]  ;;  %1925 = vst.msk [vmem:[#allocation2 + $0x190] sm:$0xff] %vm281_vm3, %v1796_v23  ;;  %1989 = vst.msk [vmem:[#allocation2 + $0x390] sm:$0xff] %vm281_vm3, %v1860_v24  ;;  %v2185_v35 = vadd.f32 %v4823_v1, %v2050_v40  ;;  %v2053_v47 = vld [vmem:[#allocation2 + $0x178] sm:$0xff]  ;;  %v2315_v51 = vmax.f32 %v2187_v38, 0.0  ;;  %v1800_v16 = vadd.f32 %v3715_v10, %v464_v61  ;;  %v1443_v18 = vpop.f32.mrb[53].mxu0 }
 0x197   : > { %2951 = vst.msk [vmem:[%s4614_s29 + $0xa4] sm:$0xf] %vm2909_vm4, %v3503_v29  ;;  %3015 = vst.msk [vmem:[%s4614_s29 + $0x1a4] sm:$0xf] %vm2909_vm4, %v3567_v30  ;;  %v2249_v46 = vadd.f32 %v4823_v1, %v2114_v41  ;;  %v2117_v48 = vld [vmem:[#allocation2 + $0x378] sm:$0xff]  ;;  %v2379_v52 = vmax.f32 %v2251_v39, 0.0  ;;  %v2188_v53 = vadd.f32 %v4823_v1, %v2053_v47  ;;  %v1798_v26 = vadd.f32 %v1443_v18, %v462_v4 }
 0x198   : > { %1923 = vst.msk [vmem:[#allocation2 + $0x180] sm:$0xff] %vm281_vm3, %v1794_v33  ;;  %1987 = vst.msk [vmem:[#allocation2 + $0x380] sm:$0xff] %vm281_vm3, %v1858_v34  ;;  %v2252_v54 = vadd.f32 %v4823_v1, %v2117_v48  ;;  %v2051_v55 = vld [vmem:[#allocation2 + $0x168] sm:$0xff]  ;;  %v2313_v57 = vmax.f32 %v2185_v35, 0.0  ;;  %v528_v62 = vld [vmem:[#allocation2 + $0x3b0] sm:$0xff]  ;;  %v3508_v63 = vpack.c.bf16 %v2315_v51, %v2315_v51  ;;  %v1699_v19 = vpop.f32.mrb[53].mxu1 }
 0x199   : > { %v2115_v56 = vld [vmem:[#allocation2 + $0x368] sm:$0xff]  ;;  %1926 = vst.msk [vmem:[#allocation2 + $0x198] sm:$0xff] %vm281_vm3, %v1797_v42  ;;  %1990 = vst.msk [vmem:[#allocation2 + $0x398] sm:$0xff] %vm281_vm3, %v1861_v43  ;;  %v2377_v58 = vmax.f32 %v2249_v46, 0.0  ;;  %v2186_v59 = vadd.f32 %v4823_v1, %v2051_v55  ;;  %v3572_v0 = vpack.c.bf16 %v2379_v52, %v2379_v52  ;;  %v2316_v2 = vmax.f32 %v2188_v53, 0.0  ;;  %v529_v13 = vld [vmem:[#allocation2 + $0x3b8] sm:$0xff] }
 0x19a   : > { %v2250_v60 = vadd.f32 %v4823_v1, %v2115_v56  ;;  %1924 = vst.msk [vmem:[#allocation2 + $0x188] sm:$0xff] %vm281_vm3, %v1795_v49  ;;  %1988 = vst.msk [vmem:[#allocation2 + $0x388] sm:$0xff] %vm281_vm3, %v1859_v50  ;;  %v2380_v3 = vmax.f32 %v2252_v54, 0.0  ;;  %v3506_v6 = vpack.c.bf16 %v2313_v57, %v2313_v57  ;;  %v1864_v17 = vadd.f32 %v3779_v11, %v528_v62  ;;  %v463_v20 = vld [vmem:[#allocation2 + $0x1a8] sm:$0xff]  ;;  %v3716_v28 = vpop.f32.mrb[54].mxu0  ;;  %v3780_v29 = vpop.f32.mrb[54].mxu1 }
 0x19b   : > { %v3570_v7 = vpack.c.bf16 %v2377_v58, %v2377_v58  ;;  %v2314_v8 = vmax.f32 %v2186_v59, 0.0  ;;  %2956 = vst.msk [vmem:[%s4614_s29 + $0xb8] sm:$0xf] %vm2909_vm4, %v3508_v63  ;;  %3020 = vst.msk [vmem:[%s4614_s29 + $0x1b8] sm:$0xf] %vm2909_vm4, %v3572_v0  ;;  %v3509_v14 = vpack.c.bf16 %v2316_v2, %v2316_v2  ;;  %v527_v21 = vld [vmem:[#allocation2 + $0x3a8] sm:$0xff]  ;;  %v1862_v27 = vadd.f32 %v1699_v19, %v526_v5 }
 0x19c   : > { %v2378_v9 = vmax.f32 %v2250_v60, 0.0  ;;  %v3573_v15 = vpack.c.bf16 %v2380_v3, %v2380_v3  ;;  %2954 = vst.msk [vmem:[%s4614_s29 + $0xb0] sm:$0xf] %vm2909_vm4, %v3506_v6  ;;  %v1801_v34 = vadd.f32 %v3716_v28, %v465_v12  ;;  %v1865_v36 = vadd.f32 %v3780_v29, %v529_v13  ;;  %v1446_v37 = vpop.f32.mrb[55].mxu0  ;;  %v1702_v38 = vpop.f32.mrb[55].mxu1  ;;  %v468_v54 = vld [vmem:[#allocation2 + $0x1d0] sm:$0xff] }
 0x19d   : > { %3018 = vst.msk [vmem:[%s4614_s29 + $0x1b0] sm:$0xf] %vm2909_vm4, %v3570_v7  ;;  %v3507_v22 = vpack.c.bf16 %v2314_v8, %v2314_v8  ;;  %v2056_v24 = vld [vmem:[#allocation2 + $0x190] sm:$0xff]  ;;  %2957 = vst.msk [vmem:[%s4614_s29 + $0xbc] sm:$0xf] %vm2909_vm4, %v3509_v14  ;;  %v1799_v43 = vadd.f32 %v1446_v37, %v463_v20  ;;  %v1863_v44 = vadd.f32 %v1702_v38, %v527_v21  ;;  %v466_v60 = vld [vmem:[#allocation2 + $0x1c0] sm:$0xff] }
 0x19e   : > { %v3571_v23 = vpack.c.bf16 %v2378_v9, %v2378_v9  ;;  %v2120_v25 = vld [vmem:[#allocation2 + $0x390] sm:$0xff]  ;;  %3021 = vst.msk [vmem:[%s4614_s29 + $0x1bc] sm:$0xf] %vm2909_vm4, %v3573_v15  ;;  %v2191_v30 = vadd.f32 %v4823_v1, %v2056_v24  ;;  %v530_v61 = vld [vmem:[#allocation2 + $0x3c0] sm:$0xff]  ;;  %v3719_v3 = vpop.f32.mrb[56].mxu0  ;;  %v3783_v4 = vpop.f32.mrb[56].mxu1 }
 0x19f   : > { %v2255_v31 = vadd.f32 %v4823_v1, %v2120_v25  ;;  %v2054_v32 = vld [vmem:[#allocation2 + $0x180] sm:$0xff]  ;;  %1929 = vst.msk [vmem:[#allocation2 + $0x1b0] sm:$0xff] %vm281_vm3, %v1800_v16  ;;  %1993 = vst.msk [vmem:[#allocation2 + $0x3b0] sm:$0xff] %vm281_vm3, %v1864_v17  ;;  %v532_v55 = vld [vmem:[#allocation2 + $0x3d0] sm:$0xff]  ;;  %v1804_v9 = vadd.f32 %v3719_v3, %v468_v54  ;;  %v1459_v11 = vpop.f32.mrb[57].mxu0  ;;  %v1715_v12 = vpop.f32.mrb[57].mxu1 }
 0x1a0   : > { %v2118_v33 = vld [vmem:[#allocation2 + $0x380] sm:$0xff]  ;;  %2955 = vst.msk [vmem:[%s4614_s29 + $0xb4] sm:$0xf] %vm2909_vm4, %v3507_v22  ;;  %3019 = vst.msk [vmem:[%s4614_s29 + $0x1b4] sm:$0xf] %vm2909_vm4, %v3571_v23  ;;  %v2189_v39 = vadd.f32 %v4823_v1, %v2054_v32  ;;  %v2057_v41 = vld [vmem:[#allocation2 + $0x198] sm:$0xff]  ;;  %v1868_v10 = vadd.f32 %v3783_v4, %v532_v55  ;;  %v1802_v19 = vadd.f32 %v1459_v11, %v466_v60 }
 0x1a1   : > { %v2253_v40 = vadd.f32 %v4823_v1, %v2118_v33  ;;  %v2121_v42 = vld [vmem:[#allocation2 + $0x398] sm:$0xff]  ;;  %1927 = vst.msk [vmem:[#allocation2 + $0x1a0] sm:$0xff] %vm281_vm3, %v1798_v26  ;;  %1991 = vst.msk [vmem:[#allocation2 + $0x3a0] sm:$0xff] %vm281_vm3, %v1862_v27  ;;  %v2319_v45 = vmax.f32 %v2191_v30, 0.0  ;;  %v2383_v35 = vmax.f32 %v2255_v31, 0.0  ;;  %v2192_v46 = vadd.f32 %v4823_v1, %v2057_v41  ;;  %v2055_v48 = vld [vmem:[#allocation2 + $0x188] sm:$0xff] }
 0x1a2   : > { %v2256_v47 = vadd.f32 %v4823_v1, %v2121_v42  ;;  %v2119_v49 = vld [vmem:[#allocation2 + $0x388] sm:$0xff]  ;;  %1930 = vst.msk [vmem:[#allocation2 + $0x1b8] sm:$0xff] %vm281_vm3, %v1801_v34  ;;  %1994 = vst.msk [vmem:[#allocation2 + $0x3b8] sm:$0xff] %vm281_vm3, %v1865_v36  ;;  %v2317_v50 = vmax.f32 %v2189_v39, 0.0  ;;  %v2190_v52 = vadd.f32 %v4823_v1, %v2055_v48  ;;  %v469_v5 = vld [vmem:[#allocation2 + $0x1d8] sm:$0xff]  ;;  %v1866_v20 = vadd.f32 %v1715_v12, %v530_v61  ;;  %v3720_v21 = vpop.f32.mrb[58].mxu0 }
 0x1a3   : > { %v2381_v51 = vmax.f32 %v2253_v40, 0.0  ;;  %v2254_v53 = vadd.f32 %v4823_v1, %v2119_v49  ;;  %1928 = vst.msk [vmem:[#allocation2 + $0x1a8] sm:$0xff] %vm281_vm3, %v1799_v43  ;;  %1992 = vst.msk [vmem:[#allocation2 + $0x3a8] sm:$0xff] %vm281_vm3, %v1863_v44  ;;  %v3512_v56 = vpack.c.bf16 %v2319_v45, %v2319_v45  ;;  %v3576_v57 = vpack.c.bf16 %v2383_v35, %v2383_v35  ;;  %v533_v6 = vld [vmem:[#allocation2 + $0x3d8] sm:$0xff]  ;;  %v467_v13 = vld [vmem:[#allocation2 + $0x1c8] sm:$0xff]  ;;  %v3784_v22 = vpop.f32.mrb[58].mxu1 }
 0x1a4   : > { %v2320_v58 = vmax.f32 %v2192_v46, 0.0  ;;  %v2384_v59 = vmax.f32 %v2256_v47, 0.0  ;;  %v3510_v62 = vpack.c.bf16 %v2317_v50, %v2317_v50  ;;  %v2318_v0 = vmax.f32 %v2190_v52, 0.0  ;;  %v531_v14 = vld [vmem:[#allocation2 + $0x3c8] sm:$0xff]  ;;  %1933 = vst.msk [vmem:[#allocation2 + $0x1d0] sm:$0xff] %vm281_vm3, %v1804_v9  ;;  %1997 = vst.msk [vmem:[#allocation2 + $0x3d0] sm:$0xff] %vm281_vm3, %v1868_v10 }
 0x1a5   : > { %v3574_v63 = vpack.c.bf16 %v2381_v51, %v2381_v51  ;;  %v2382_v2 = vmax.f32 %v2254_v53, 0.0  ;;  %2960 = vst.msk [vmem:[%s4614_s29 + $0xc8] sm:$0xf] %vm2909_vm4, %v3512_v56  ;;  %3024 = vst.msk [vmem:[%s4614_s29 + $0x1c8] sm:$0xf] %vm2909_vm4, %v3576_v57  ;;  %v1805_v27 = vadd.f32 %v3720_v21, %v469_v5  ;;  %v1869_v28 = vadd.f32 %v3784_v22, %v533_v6  ;;  %v1462_v29 = vpop.f32.mrb[59].mxu0 }
 0x1a6   : > { %v3513_v7 = vpack.c.bf16 %v2320_v58, %v2320_v58  ;;  %v3577_v8 = vpack.c.bf16 %v2384_v59, %v2384_v59  ;;  %2958 = vst.msk [vmem:[%s4614_s29 + $0xc0] sm:$0xf] %vm2909_vm4, %v3510_v62  ;;  %v3511_v15 = vpack.c.bf16 %v2318_v0, %v2318_v0  ;;  %v2060_v17 = vld [vmem:[#allocation2 + $0x1b0] sm:$0xff]  ;;  %v1718_v30 = vpop.f32.mrb[59].mxu1  ;;  %v1803_v36 = vadd.f32 %v1462_v29, %v467_v13  ;;  %v470_v53 = vld [vmem:[#allocation2 + $0x1e0] sm:$0xff]  ;;  %v3723_v59 = vpop.f32.mrb[60].mxu0 }
 0x1a7   : > { %3022 = vst.msk [vmem:[%s4614_s29 + $0x1c0] sm:$0xf] %vm2909_vm4, %v3574_v63  ;;  %v3575_v16 = vpack.c.bf16 %v2382_v2, %v2382_v2  ;;  %v2124_v18 = vld [vmem:[#allocation2 + $0x3b0] sm:$0xff]  ;;  %v2195_v23 = vadd.f32 %v4823_v1, %v2060_v17  ;;  %v1867_v37 = vadd.f32 %v1718_v30, %v531_v14  ;;  %v534_v54 = vld [vmem:[#allocation2 + $0x3e0] sm:$0xff]  ;;  %v3787_v60 = vpop.f32.mrb[60].mxu1  ;;  %v473_v61 = vld [vmem:[#allocation2 + $0x1f8] sm:$0xff] }
 0x1a8   : > { %2961 = vst.msk [vmem:[%s4614_s29 + $0xcc] sm:$0xf] %vm2909_vm4, %v3513_v7  ;;  %3025 = vst.msk [vmem:[%s4614_s29 + $0x1cc] sm:$0xf] %vm2909_vm4, %v3577_v8  ;;  %v2259_v24 = vadd.f32 %v4823_v1, %v2124_v18  ;;  %v2058_v25 = vld [vmem:[#allocation2 + $0x1a0] sm:$0xff]  ;;  %v472_v47 = vld [vmem:[#allocation2 + $0x1f0] sm:$0xff] }
 0x1a9   : > { %v2122_v26 = vld [vmem:[#allocation2 + $0x3a0] sm:$0xff]  ;;  %2959 = vst.msk [vmem:[%s4614_s29 + $0xc4] sm:$0xf] %vm2909_vm4, %v3511_v15  ;;  %3023 = vst.msk [vmem:[%s4614_s29 + $0x1c4] sm:$0xf] %vm2909_vm4, %v3575_v16  ;;  %v2193_v31 = vadd.f32 %v4823_v1, %v2058_v25  ;;  %v2061_v33 = vld [vmem:[#allocation2 + $0x1b8] sm:$0xff]  ;;  %v1808_v2 = vadd.f32 %v3723_v59, %v472_v47 }
 0x1aa   : > { %v2257_v32 = vadd.f32 %v4823_v1, %v2122_v26  ;;  %v2125_v34 = vld [vmem:[#allocation2 + $0x3b8] sm:$0xff]  ;;  %1931 = vst.msk [vmem:[#allocation2 + $0x1c0] sm:$0xff] %vm281_vm3, %v1802_v19  ;;  %1995 = vst.msk [vmem:[#allocation2 + $0x3c0] sm:$0xff] %vm281_vm3, %v1866_v20  ;;  %v2323_v38 = vmax.f32 %v2195_v23, 0.0  ;;  %v2387_v39 = vmax.f32 %v2259_v24, 0.0  ;;  %v2196_v40 = vadd.f32 %v4823_v1, %v2061_v33  ;;  %v2059_v42 = vld [vmem:[#allocation2 + $0x1a8] sm:$0xff] }
 0x1ab   : > { %v2260_v41 = vadd.f32 %v4823_v1, %v2125_v34  ;;  %v2123_v43 = vld [vmem:[#allocation2 + $0x3a8] sm:$0xff]  ;;  %1934 = vst.msk [vmem:[#allocation2 + $0x1d8] sm:$0xff] %vm281_vm3, %v1805_v27  ;;  %1998 = vst.msk [vmem:[#allocation2 + $0x3d8] sm:$0xff] %vm281_vm3, %v1869_v28  ;;  %v2321_v44 = vmax.f32 %v2193_v31, 0.0  ;;  %v2194_v35 = vadd.f32 %v4823_v1, %v2059_v42  ;;  %v536_v48 = vld [vmem:[#allocation2 + $0x3f0] sm:$0xff]  ;;  %v1475_v4 = vpop.f32.mrb[61].mxu0 }
 0x1ac   : > { %v2385_v45 = vmax.f32 %v2257_v32, 0.0  ;;  %v2258_v46 = vadd.f32 %v4823_v1, %v2123_v43  ;;  %1932 = vst.msk [vmem:[#allocation2 + $0x1c8] sm:$0xff] %vm281_vm3, %v1803_v36  ;;  %1996 = vst.msk [vmem:[#allocation2 + $0x3c8] sm:$0xff] %vm281_vm3, %v1867_v37  ;;  %v3516_v49 = vpack.c.bf16 %v2323_v38, %v2323_v38  ;;  %v3580_v50 = vpack.c.bf16 %v2387_v39, %v2387_v39  ;;  %v537_v62 = vld [vmem:[#allocation2 + $0x3f8] sm:$0xff]  ;;  %v1731_v5 = vpop.f32.mrb[61].mxu1  ;;  %v471_v6 = vld [vmem:[#allocation2 + $0x1e8] sm:$0xff] }
 0x1ad   : > { %v2324_v51 = vmax.f32 %v2196_v40, 0.0  ;;  %v2388_v52 = vmax.f32 %v2260_v41, 0.0  ;;  %v3514_v55 = vpack.c.bf16 %v2321_v44, %v2321_v44  ;;  %v2322_v57 = vmax.f32 %v2194_v35, 0.0  ;;  %v535_v7 = vld [vmem:[#allocation2 + $0x3e8] sm:$0xff]  ;;  %v2064_v10 = vld [vmem:[#allocation2 + $0x1d0] sm:$0xff]  ;;  %v3724_v14 = vpop.f32.mrb[62].mxu0 }
 0x1ae   : > { %v3578_v56 = vpack.c.bf16 %v2385_v45, %v2385_v45  ;;  %v2386_v58 = vmax.f32 %v2258_v46, 0.0  ;;  %2964 = vst.msk [vmem:[%s4614_s29 + $0xd8] sm:$0xf] %vm2909_vm4, %v3516_v49  ;;  %3028 = vst.msk [vmem:[%s4614_s29 + $0x1d8] sm:$0xf] %vm2909_vm4, %v3580_v50  ;;  %v1872_v3 = vadd.f32 %v3787_v60, %v536_v48  ;;  %v2128_v11 = vld [vmem:[#allocation2 + $0x3d0] sm:$0xff]  ;;  %v1806_v12 = vadd.f32 %v1475_v4, %v470_v53 }
 0x1af   : > { %v3517_v63 = vpack.c.bf16 %v2324_v51, %v2324_v51  ;;  %v3581_v0 = vpack.c.bf16 %v2388_v52, %v2388_v52  ;;  %2962 = vst.msk [vmem:[%s4614_s29 + $0xd0] sm:$0xf] %vm2909_vm4, %v3514_v55  ;;  %v3515_v8 = vpack.c.bf16 %v2322_v57, %v2322_v57  ;;  %v1870_v13 = vadd.f32 %v1731_v5, %v534_v54  ;;  %v3788_v15 = vpop.f32.mrb[62].mxu1  ;;  %v1478_v22 = vpop.f32.mrb[63].mxu0  ;;  %v3921_v24 = vld [vmem:[%s5167_s2] ss:$0 sm:$0xff] }
 0x1b0   : > { %3026 = vst.msk [vmem:[%s4614_s29 + $0x1d0] sm:$0xf] %vm2909_vm4, %v3578_v56  ;;  %v3579_v9 = vpack.c.bf16 %v2386_v58, %v2386_v58  ;;  %v2199_v16 = vadd.f32 %v4823_v1, %v2064_v10  ;;  %v2263_v17 = vadd.f32 %v4823_v1, %v2128_v11  ;;  %v1809_v20 = vadd.f32 %v3724_v14, %v473_v61  ;;  %v1734_v23 = vpop.f32.mrb[63].mxu1 }
 0x1b1   : > { %2965 = vst.msk [vmem:[%s4614_s29 + $0xdc] sm:$0xf] %vm2909_vm4, %v3517_v63  ;;  %3029 = vst.msk [vmem:[%s4614_s29 + $0x1dc] sm:$0xf] %vm2909_vm4, %v3581_v0  ;;  %v2062_v18 = vld [vmem:[#allocation2 + $0x1c0] sm:$0xff]  ;;  %v1873_v21 = vadd.f32 %v3788_v15, %v537_v62  ;;  %v1807_v28 = vadd.f32 %v1478_v22, %v471_v6  ;;  %v1871_v29 = vadd.f32 %v1734_v23, %v535_v7 }
 0x1b2   : > { %v2126_v19 = vld [vmem:[#allocation2 + $0x3c0] sm:$0xff]  ;;  %1937 = vst.msk [vmem:[#allocation2 + $0x1f0] sm:$0xff] %vm281_vm3, %v1808_v2  ;;  %2001 = vst.msk [vmem:[#allocation2 + $0x3f0] sm:$0xff] %vm281_vm3, %v1872_v3  ;;  %v2197_v25 = vadd.f32 %v3921_v24, %v2062_v18  ;;  %v2065_v26 = vld [vmem:[#allocation2 + $0x1d8] sm:$0xff]  ;;  %v2327_v30 = vmax.f32 %v2199_v16, 0.0  ;;  %v2391_v31 = vmax.f32 %v2263_v17, 0.0 }
 0x1b3   : > { %2963 = vst.msk [vmem:[%s4614_s29 + $0xd4] sm:$0xf] %vm2909_vm4, %v3515_v8  ;;  %3027 = vst.msk [vmem:[%s4614_s29 + $0x1d4] sm:$0xf] %vm2909_vm4, %v3579_v9  ;;  %v2261_v1 = vadd.f32 %v3921_v24, %v2126_v19  ;;  %v2129_v27 = vld [vmem:[#allocation2 + $0x3d8] sm:$0xff]  ;;  %v2200_v32 = vadd.f32 %v3921_v24, %v2065_v26  ;;  %v2063_v34 = vld [vmem:[#allocation2 + $0x1c8] sm:$0xff] }
 0x1b4   : > { %1935 = vst.msk [vmem:[#allocation2 + $0x1e0] sm:$0xff] %vm281_vm3, %v1806_v12  ;;  %1999 = vst.msk [vmem:[#allocation2 + $0x3e0] sm:$0xff] %vm281_vm3, %v1870_v13  ;;  %v2264_v33 = vadd.f32 %v3921_v24, %v2129_v27  ;;  %v2127_v36 = vld [vmem:[#allocation2 + $0x3c8] sm:$0xff]  ;;  %v2325_v37 = vmax.f32 %v2197_v25, 0.0  ;;  %v2198_v39 = vadd.f32 %v3921_v24, %v2063_v34  ;;  %v3520_v41 = vpack.c.bf16 %v2327_v30, %v2327_v30 }
 0x1b5   : > { %1938 = vst.msk [vmem:[#allocation2 + $0x1f8] sm:$0xff] %vm281_vm3, %v1809_v20  ;;  %2002 = vst.msk [vmem:[#allocation2 + $0x3f8] sm:$0xff] %vm281_vm3, %v1873_v21  ;;  %v2389_v38 = vmax.f32 %v2261_v1, 0.0  ;;  %v2262_v40 = vadd.f32 %v3921_v24, %v2127_v36  ;;  %v3584_v42 = vpack.c.bf16 %v2391_v31, %v2391_v31  ;;  %v2328_v43 = vmax.f32 %v2200_v32, 0.0 }
 0x1b6   : > { %1936 = vst.msk [vmem:[#allocation2 + $0x1e8] sm:$0xff] %vm281_vm3, %v1807_v28  ;;  %2000 = vst.msk [vmem:[#allocation2 + $0x3e8] sm:$0xff] %vm281_vm3, %v1871_v29  ;;  %v2392_v44 = vmax.f32 %v2264_v33, 0.0  ;;  %v3518_v45 = vpack.c.bf16 %v2325_v37, %v2325_v37  ;;  %v2326_v46 = vmax.f32 %v2198_v39, 0.0 }
 0x1b7   : > { %v3582_v35 = vpack.c.bf16 %v2389_v38, %v2389_v38  ;;  %v2390_v47 = vmax.f32 %v2262_v40, 0.0  ;;  %2968 = vst.msk [vmem:[%s4614_s29 + $0xe8] sm:$0xf] %vm2909_vm4, %v3520_v41  ;;  %3032 = vst.msk [vmem:[%s4614_s29 + $0x1e8] sm:$0xf] %vm2909_vm4, %v3584_v42  ;;  %v3521_v48 = vpack.c.bf16 %v2328_v43, %v2328_v43 }
 0x1b8   : > { %v3585_v49 = vpack.c.bf16 %v2392_v44, %v2392_v44  ;;  %2966 = vst.msk [vmem:[%s4614_s29 + $0xe0] sm:$0xf] %vm2909_vm4, %v3518_v45  ;;  %v3519_v50 = vpack.c.bf16 %v2326_v46, %v2326_v46 }
 0x1b9   : > { %3030 = vst.msk [vmem:[%s4614_s29 + $0x1e0] sm:$0xf] %vm2909_vm4, %v3582_v35  ;;  %v3583_v51 = vpack.c.bf16 %v2390_v47, %v2390_v47  ;;  %v2068_v52 = vld [vmem:[#allocation2 + $0x1f0] sm:$0xff]  ;;  %2969 = vst.msk [vmem:[%s4614_s29 + $0xec] sm:$0xf] %vm2909_vm4, %v3521_v48 }
 0x1ba   : > { %v2132_v53 = vld [vmem:[#allocation2 + $0x3f0] sm:$0xff]  ;;  %3033 = vst.msk [vmem:[%s4614_s29 + $0x1ec] sm:$0xf] %vm2909_vm4, %v3585_v49  ;;  %v2203_v54 = vadd.f32 %v3921_v24, %v2068_v52  ;;  %2967 = vst.msk [vmem:[%s4614_s29 + $0xe4] sm:$0xf] %vm2909_vm4, %v3519_v50 }
 0x1bb   : > { %v2267_v55 = vadd.f32 %v3921_v24, %v2132_v53  ;;  %v2066_v56 = vld [vmem:[#allocation2 + $0x1e0] sm:$0xff]  ;;  %3031 = vst.msk [vmem:[%s4614_s29 + $0x1e4] sm:$0xf] %vm2909_vm4, %v3583_v51 }
 0x1bc   : > { %v2130_v57 = vld [vmem:[#allocation2 + $0x3e0] sm:$0xff]  ;;  %v2201_v58 = vadd.f32 %v3921_v24, %v2066_v56  ;;  %v2069_v60 = vld [vmem:[#allocation2 + $0x1f8] sm:$0xff]  ;;  %v2331_v62 = vmax.f32 %v2203_v54, 0.0 }
 0x1bd   : > { %v2265_v59 = vadd.f32 %v3921_v24, %v2130_v57  ;;  %v2133_v61 = vld [vmem:[#allocation2 + $0x3f8] sm:$0xff]  ;;  %v2395_v63 = vmax.f32 %v2267_v55, 0.0  ;;  %v2204_v0 = vadd.f32 %v3921_v24, %v2069_v60  ;;  %v2067_v3 = vld [vmem:[#allocation2 + $0x1e8] sm:$0xff] }
 0x1be   : > { %v2268_v2 = vadd.f32 %v3921_v24, %v2133_v61  ;;  %v2131_v4 = vld [vmem:[#allocation2 + $0x3e8] sm:$0xff]  ;;  %v2329_v5 = vmax.f32 %v2201_v58, 0.0  ;;  %v2202_v7 = vadd.f32 %v3921_v24, %v2067_v3  ;;  %v3524_v9 = vpack.c.bf16 %v2331_v62, %v2331_v62 }
 0x1bf   : > { %v2393_v6 = vmax.f32 %v2265_v59, 0.0  ;;  %v2266_v8 = vadd.f32 %v3921_v24, %v2131_v4  ;;  %v3588_v10 = vpack.c.bf16 %v2395_v63, %v2395_v63  ;;  %v2332_v11 = vmax.f32 %v2204_v0, 0.0  ;;  %3045 = sbr.rel (!%p4109_p9) target bundleno = 482 (0x1e2), region = 48 }
 0x1c0   : > { %v2396_v12 = vmax.f32 %v2268_v2, 0.0  ;;  %v3522_v13 = vpack.c.bf16 %v2329_v5, %v2329_v5  ;;  %v2330_v15 = vmax.f32 %v2202_v7, 0.0  ;;  %2972 = vst.msk [vmem:[%s4614_s29 + $0xf8] sm:$0xf] %vm2909_vm4, %v3524_v9 }
 0x1c1   : > { %v3586_v14 = vpack.c.bf16 %v2393_v6, %v2393_v6  ;;  %v2394_v16 = vmax.f32 %v2266_v8, 0.0  ;;  %3036 = vst.msk [vmem:[%s4614_s29 + $0x1f8] sm:$0xf] %vm2909_vm4, %v3588_v10  ;;  %v3525_v17 = vpack.c.bf16 %v2332_v11, %v2332_v11 }
 0x1c2   : > { %v3589_v18 = vpack.c.bf16 %v2396_v12, %v2396_v12  ;;  %2970 = vst.msk [vmem:[%s4614_s29 + $0xf0] sm:$0xf] %vm2909_vm4, %v3522_v13  ;;  %v3523_v19 = vpack.c.bf16 %v2330_v15, %v2330_v15 }
 0x1c3   : > { %3034 = vst.msk [vmem:[%s4614_s29 + $0x1f0] sm:$0xf] %vm2909_vm4, %v3586_v14  ;;  %v3587_v20 = vpack.c.bf16 %v2394_v16, %v2394_v16  ;;  %2973 = vst.msk [vmem:[%s4614_s29 + $0xfc] sm:$0xf] %vm2909_vm4, %v3525_v17 }
 0x1c4   : > { %3037 = vst.msk [vmem:[%s4614_s29 + $0x1fc] sm:$0xf] %vm2909_vm4, %v3589_v18  ;;  %2971 = vst.msk [vmem:[%s4614_s29 + $0xf4] sm:$0xf] %vm2909_vm4, %v3523_v19 }
 0x1c5   : > { %3035 = vst.msk [vmem:[%s4614_s29 + $0x1f4] sm:$0xf] %vm2909_vm4, %v3587_v20 }
 0x1c6   : > { %s5183_s21 = smov (!%p3048_p8, %s3047_s21), 128 }
 0x1c7   : > { %s5102_s22 = sshll.u32 %s5183_s21, 6 }
 0x1c8   : > { %s3052_s27 = ssub.s32 8192, %s5102_s22 }
 0x1c9   : > { %3053 = vsyncadd %s3039_s9, %s3052_s27  ;;  %p3455_p11 = scmp.ne.s32.totalorder %s5102_s22, 0  ;;  %s3590_s24 = sshll.u32 %s4024_s15, 13 }
 0x1ca   : > { %s5112_s11 = scalar_lea.hbm %s5168_s3, %s3590_s24  ;;  %s3059_s18 = sshll.u32 %s4614_s29, 4  ;;  %s5115_s18 = int_to_ptr.vmem [resolvable:$true] %s3059_s18 }
 0x1cb   : > { %s3950_s23 = scalar_lea.vmem %s5115_s18, %s5102_s22  ;;  %s4039_s28 = smov [#allocation6]  }
 0x1cc   : > { %p3951_p9 = scmp.ne.s32.totalorder %s5115_s18, %s3950_s23  ;;  %s3954_s30 = sshll.u32 %s4039_s28, 4  ;;  %s3955_s30 = int_to_ptr.vmem [resolvable:$false] %s3954_s30 }
 0x1cd   : > { %s3956_s15 = scalar_lea.vmem %s3955_s30, 16384  ;;  %p3957_p13 = scmp.lt.s32.totalorder %s5115_s18, %s3955_s30 }
 0x1ce   : > { %p3952_p0 = pnand %p3951_p9, %p3455_p11  ;;  %p3958_p1 = scmp.lt.s32.totalorder %s3956_s15, %s3950_s23 }
 0x1d0   : > { %p3953_p12 = pneg %p3952_p0  ;;  %p3959_p2 = por %p3958_p1, %p3957_p13 }
 0x1d2   : > { %p3960_p4 = pnand %p3959_p2, %p3953_p12 }
 0x1d4   : > { %3963 = shalt.err (!%p3960_p4)
}
 0x1d5   : > { %s3964_s29 = scalar_lea.hbm %s5112_s11, %s5102_s22  ;;  %s3968_s8 = scalar_lea.hbm %s5168_s3, 720000 }
 0x1d6   : > { %p3965_p5 = scmp.ne.s32.totalorder %s5112_s11, %s3964_s29  ;;  %p3969_p7 = scmp.lt.u32.totalorder %s5112_s11, %s5168_s3 }
 0x1d7   : > { %p3970_p10 = scmp.lt.u32.totalorder %s3968_s8, %s3964_s29  ;;  %p3972_p9 = scmp.lt.u32.totalorder %s3964_s29, %s5112_s11 }
 0x1d8   : > { %p3966_p6 = pnand %p3965_p5, %p3455_p11 }
 0x1d9   : > { %p3971_p8 = por %p3970_p10, %p3969_p7 }
 0x1da   : > { %p3967_p3 = pneg %p3966_p6 }
 0x1db   : > { %p3973_p0 = por %p3972_p9, %p3971_p8 }
 0x1dd   : > { %p3974_p12 = pnand %p3973_p0, %p3967_p3 }
 0x1df   : > { %3977 = shalt.err (!%p3974_p12)
}
 0x1e0   : > { %s4040_s27 = smov 64   ;;  %s4041_s24 = smov 4  }
 0x1e1   : > { %3065 = dma.vmem_to_hbm [thread:$0]  (%p3455_p11), %s5115_s18, %s5102_s22, %s5112_s11, %s3039_s9, %s4040_s27, %s4040_s27, %s4041_s24  }
 0x1e2 PF: > { %p3799_p13 = scmp.ge.s32.totalorder %s4032_s17, 2  ;;  %s3074_s4 = sand.u32 1, %s4012_s12  }
 0x1e3   : > { %p5172_p1 = scmp.ne.s32.totalorder %s5171_s26, 0  ;;  %s3075_s6 = scalar_lea.sflag [#allocation5], %s3074_s4 }
 0x1e5   : > { %p3796_p2 = pnand %p3799_p13, %p5172_p1 }
 0x1e7   : > { %4007 = dma.done.wait (!%p3796_p2), %s3075_s6, 8192  }
 0x1e8   : > { %4009 = vsyncadd (!%p3796_p2), %s3075_s6, 4294959104  ;;  %s19_s17 = sadd.s32 1, %s4032_s17   ;;  %s5173_s12 = smov %s4016_s13 }
 0x1e9   : > { %p16_p4 = scmp.ge.s32.totalorder %s19_s17, 90   ;;  %s5174_s13 = smov %s4020_s14 }
 0x1ea   : > { %s5175_s14 = smov %s4114_s25  ;;  %s5176_s15 = smov %s4028_s16 }
 0x1eb   : > { %s5177_s16 = smov %s5179_s20  ;;  %18 = sbr.rel (!%p16_p4) target bundleno = 6 (0x6), region = 91 }
 0x1f2   :  { %3080 = vsyncpa [#allocation4], 1 }
 0x1f3   :  { %3082 = vsyncpa [#allocation4 + $0x1], 1 }
 0x1f4   :  { %3083 = vsyncpa [#allocation5], 1 }
 0x1f5   :  { %3085 = vsyncpa [#allocation5 + $0x1], 1 }

</bundles_post_ra>
